<compile_context>
chip_gen: v7x
topology: tpu7x:2x2x1
jax: 0.10.0
libtpu: 0.0.40
codegen_flags: <defaults>
</compile_context>

<pallas_src>
import functools

import jax
import jax.numpy as jnp
from jax import lax
from jax.experimental import pallas as pl
from jax.experimental.pallas import tpu as pltpu


def _agl_kernel(lam_ref, xn_ref, a_raw_ref, a_final_ref, a_learned_ref,
                *, kp1, tm, exact_tie_break):
    lam = lam_ref[0]                                    # sigmoid(lambda), f32 scalar in SMEM

    i = pl.program_id(0)
    row_start = pl.multiple_of(i * tm, tm)

    xf = xn_ref[...]                                    # (N, D) pre-normalized features
    xb = xn_ref[pl.ds(row_start, tm), :]                # (TM, D) rows of this block

    # S_block = X_norm[block] @ X_norm.T  -> (TM, N) on the MXU, f32 accumulate.
    s = lax.dot_general(xb, xf,
                        dimension_numbers=(((1,), (1,)), ((), ())),
                        preferred_element_type=jnp.float32)

    tm_, n = s.shape
    col_ids = lax.broadcasted_iota(jnp.int32, (tm_, n), 1)

    # top-(k+1) per row: unrolled iterative argmax (k is small)
    neg = jnp.float32(-3.0e38)
    work = s
    keep = jnp.zeros((tm_, n), dtype=jnp.bool_)
    for _ in range(kp1):
        m = jnp.max(work, axis=-1, keepdims=True)
        is_max = work == m
        if exact_tie_break:
            # First-occurrence tie break (matches torch.topk for distinct values
            # and picks the lowest column among exact ties): 2 XLU reduces/iter.
            first_col = jnp.min(jnp.where(is_max, col_ids, n), axis=-1,
                                keepdims=True)
            sel = col_ids == first_col
        else:
            # Fast path: assumes values within a row are distinct -> 1 XLU
            # reduce per iteration (ties would select all maxima at once).
            sel = is_max
        keep = jnp.logical_or(keep, sel)
        work = jnp.where(sel, neg, work)

    # Drop self-loops: one (tm, 1) iota broadcast against col_ids (no full
    # (tm, N) row-id temporary).
    row_col = lax.broadcasted_iota(jnp.int32, (tm_, 1), 0) + row_start
    offdiag = col_ids != row_col
    a_unnorm = jnp.where(jnp.logical_and(keep, offdiag), s, jnp.float32(0.0))

    # Row normalization (this block holds the full row).
    row_sum = jnp.sum(a_unnorm, axis=-1, keepdims=True) + jnp.float32(1e-6)
    a_learned = a_unnorm / row_sum

    # A_final = lambda * A_raw + (1 - lambda) * A_learned
    a_raw = a_raw_ref[...].astype(jnp.float32)
    a_final = lam * a_raw + (jnp.float32(1.0) - lam) * a_learned

    a_learned_ref[...] = a_learned
    a_final_ref[...] = a_final


def _pick_tm(n, d, x_itemsize, tm_max=256, vmem_budget=40 * 1024 * 1024):
    """Largest multiple-of-8 divisor of n <= tm_max whose working set fits."""
    cands = [t for t in range(8, min(n, tm_max) + 1, 8) if n % t == 0]
    if not cands:
        return n  # single block spanning all rows (block == full array extent)
    for t in reversed(cands):
        # Rough estimate: ~6 live (t, n) f32 temporaries inside the kernel
        # + double-buffered A_raw input and both outputs (3 * 2 * t * n f32)
        # + the (double-buffered) resident X_norm operand.
        est = 4 * (6 * t * n + 6 * t * n) + 2 * n * d * x_itemsize
        if est <= vmem_budget:
            return t
    return cands[0]


def adaptive_graph_learning(x, a_raw, lambda_param, *, k=10, tm=None,
                            matmul_dtype=None, exact_tie_break=True):
    """Returns (A_final, A_learned) as dense (N, N) float32 arrays."""
    n, d = x.shape
    assert a_raw.shape == (n, n)
    kp1 = min(k + 1, n)

    # Hoisted pre-pass (previously recomputed on every grid step):
    # F.normalize(X, p=2, dim=1) = x / max(||x||_2, 1e-12)
    x = x.astype(jnp.float32)
    norms = jnp.sqrt(jnp.sum(x * x, axis=1, keepdims=True))
    xn = x / jnp.maximum(norms, jnp.float32(1e-12))
    if matmul_dtype is not None:
        # e.g. jnp.bfloat16 MXU inputs (f32 accumulate); biggest win on v5e.
        xn = xn.astype(matmul_dtype)

    if tm is None:
        tm = _pick_tm(n, d, jnp.dtype(xn.dtype).itemsize)
    assert n % tm == 0, "row tile must divide N"

    lam = jax.nn.sigmoid(jnp.asarray(lambda_param, jnp.float32)).reshape((1,))

    kernel = functools.partial(_agl_kernel, kp1=kp1, tm=tm,
                               exact_tie_break=exact_tie_break)

    out_shapes = (jax.ShapeDtypeStruct((n, n), jnp.float32),
                  jax.ShapeDtypeStruct((n, n), jnp.float32))

    grid_spec = pltpu.PrefetchScalarGridSpec(
        num_scalar_prefetch=0,
        grid=(n // tm,),
        in_specs=[
            pl.BlockSpec(memory_space=pltpu.MemorySpace.SMEM),  # sigmoid(lambda)
            # X_norm: constant block index -> fetched once per core by the
            # pipeline (block rows are sliced from it inside the kernel).
            pl.BlockSpec((n, d), lambda i: (0, 0)),
            pl.BlockSpec((tm, n), lambda i: (i, 0)),            # A_raw rows
        ],
        out_specs=[
            pl.BlockSpec((tm, n), lambda i: (i, 0)),            # A_final rows
            pl.BlockSpec((tm, n), lambda i: (i, 0)),            # A_learned rows
        ],
    )

    a_final, a_learned = pl.pallas_call(
        kernel,
        out_shape=out_shapes,
        grid_spec=grid_spec,
        compiler_params=pltpu.CompilerParams(
            dimension_semantics=("parallel",),
            vmem_limit_bytes=64 * 1024 * 1024),
    )(lam, xn, a_raw)
    return a_final, a_learned


def _reference(x, a_raw, lambda_param, k):
    """Pure-JAX reference mirroring the PyTorch module (dense outputs)."""
    n = x.shape[0]
    kp1 = min(k + 1, n)
    xnorm = x / jnp.maximum(jnp.linalg.norm(x, axis=1, keepdims=True), 1e-12)
    s = xnorm @ xnorm.T
    vals, idxs = jax.lax.top_k(s, kp1)
    rows = jnp.repeat(jnp.arange(n), kp1)
    cols = idxs.reshape(-1)
    v = vals.reshape(-1)
    v = jnp.where(rows != cols, v, 0.0)
    a_dense = jnp.zeros((n, n), jnp.float32).at[rows, cols].add(v)
    row_sum = a_dense.sum(axis=1, keepdims=True) + 1e-6
    a_learned = a_dense / row_sum
    lam = jax.nn.sigmoid(jnp.float32(lambda_param))
    a_final = lam * a_raw + (1.0 - lam) * a_learned
    return a_final, a_learned


if __name__ == "__main__":
    # Small deterministic example: N=64 nodes, D=32 features, k=5 neighbors.
    key = jax.random.PRNGKey(0)
    kx, ka = jax.random.split(key)
    N, D, K = 64, 32, 5

    x = jax.random.normal(kx, (N, D), dtype=jnp.float32)
    a_raw = (jax.random.uniform(ka, (N, N)) < 0.1).astype(jnp.float32)
    lambda_param = jnp.float32(0.5)   # nn.Parameter(torch.tensor(0.5)) init

    # Default path: f32 MXU inputs, exact first-occurrence tie handling.
    a_final, a_learned = adaptive_graph_learning(x, a_raw, lambda_param, k=K)
    jax.block_until_ready((a_final, a_learned))

    a_final_ref, a_learned_ref = _reference(x, a_raw, lambda_param, K)
    assert jnp.allclose(a_learned, a_learned_ref, atol=1e-5, rtol=1e-5)
    assert jnp.allclose(a_final, a_final_ref, atol=1e-5, rtol=1e-5)

    # Performance variant smoke-run: bf16 MXU inputs + single-reduce top-k
    # (values differ by ~1e-3 from the f32 reference, so only sanity-check).
    a_final_fast, a_learned_fast = adaptive_graph_learning(
        x, a_raw, lambda_param, k=K,
        matmul_dtype=jnp.bfloat16, exact_tie_break=False)
    jax.block_until_ready((a_final_fast, a_learned_fast))
    assert a_final_fast.shape == (N, N) and a_learned_fast.shape == (N, N)
    assert bool(jnp.all(jnp.isfinite(a_final_fast)))
    assert bool(jnp.all(jnp.isfinite(a_learned_fast)))

    print("KERNEL_OK")
</pallas_src>

<mosaic_0001>
module attributes {stable_mosaic.version = 11 : i64} {
  func.func @_agl_kernel(%arg0: i32, %arg1: memref<1xf32, #tpu.memory_space<smem>>, %arg2: memref<64x32xf32, #tpu.memory_space<vmem>>, %arg3: memref<64x64xf32, #tpu.memory_space<vmem>>, %arg4: memref<64x64xf32, #tpu.memory_space<vmem>>, %arg5: memref<64x64xf32, #tpu.memory_space<vmem>>) attributes {dimension_semantics = [#tpu.dimension_semantics<parallel>], iteration_bounds = array<i64: 1>, scalar_prefetch = 0 : i64, scratch_operands = 0 : i64, tpu.core_type = #tpu.core_type<tc>, window_params = [{transform_indices = @transform_0, window_bounds = array<i64: 1>}, {pipeline_mode = #tpu.pipeline_mode<synchronous>, transform_indices = @transform_1, window_bounds = array<i64: 64, 32>}, {transform_indices = @transform_2, window_bounds = array<i64: 64, 64>}, {transform_indices = @transform_3, window_bounds = array<i64: 64, 64>}, {transform_indices = @transform_4, window_bounds = array<i64: 64, 64>}]} {
    %c0 = arith.constant 0 : index
    %0 = memref.load %arg1[%c0] : memref<1xf32, #tpu.memory_space<smem>>
    %c64_i32 = arith.constant 64 : i32
    %1 = arith.muli %arg0, %c64_i32 : i32
    %2 = tpu.assume_multiple %1, 64 : i32
    %c0_0 = arith.constant 0 : index
    %c0_1 = arith.constant 0 : index
    %3 = vector.load %arg2[%c0_0, %c0_1] : memref<64x32xf32, #tpu.memory_space<vmem>>, vector<64x32xf32>
    %4 = arith.index_cast %2 : i32 to index
    %c0_2 = arith.constant 0 : index
    %5 = vector.load %arg2[%4, %c0_2] : memref<64x32xf32, #tpu.memory_space<vmem>>, vector<64x32xf32>
    %cst = arith.constant dense<0.000000e+00> : vector<64x64xf32>
    %6 = tpu.matmul %5, %3, %cst {dimension_numbers = #tpu.dot_dimension_numbers<[1], [1], [0], [0], [0, 0, 1, 0], [], []>} : vector<64x32xf32>, vector<64x32xf32>, vector<64x64xf32> -> vector<64x64xf32>
    %7 = tpu.iota {dimensions = array<i32: 1>} : vector<64x64xi32>
    %false = arith.constant false
    %8 = vector.broadcast %false : i1 to vector<64x64xi1>
    %cst_3 = arith.constant dense<0xFF800000> : vector<64xf32>
    %9 = vector.multi_reduction <maximumf>, %6, %cst_3 [1] : vector<64x64xf32> to vector<64xf32>
    %10 = vector.shape_cast %9 : vector<64xf32> to vector<64x1xf32>
    %11 = vector.broadcast %10 : vector<64x1xf32> to vector<64x64xf32>
    %12 = arith.cmpf oeq, %6, %11 : vector<64x64xf32>
    %c64_i32_4 = arith.constant 64 : i32
    %13 = vector.broadcast %c64_i32_4 : i32 to vector<64x64xi32>
    %14 = arith.select %12, %7, %13 : vector<64x64xi1>, vector<64x64xi32>
    %cst_5 = arith.constant dense<2147483647> : vector<64xi32>
    %15 = vector.multi_reduction <minsi>, %14, %cst_5 [1] : vector<64x64xi32> to vector<64xi32>
    %16 = vector.shape_cast %15 : vector<64xi32> to vector<64x1xi32>
    %17 = vector.broadcast %16 : vector<64x1xi32> to vector<64x64xi32>
    %18 = arith.cmpi eq, %7, %17 : vector<64x64xi32>
    %19 = arith.ori %8, %18 : vector<64x64xi1>
    %cst_6 = arith.constant -3.000000e+38 : f32
    %20 = vector.broadcast %cst_6 : f32 to vector<64x64xf32>
    %21 = arith.select %18, %20, %6 : vector<64x64xi1>, vector<64x64xf32>
    %cst_7 = arith.constant dense<0xFF800000> : vector<64xf32>
    %22 = vector.multi_reduction <maximumf>, %21, %cst_7 [1] : vector<64x64xf32> to vector<64xf32>
    %23 = vector.shape_cast %22 : vector<64xf32> to vector<64x1xf32>
    %24 = vector.broadcast %23 : vector<64x1xf32> to vector<64x64xf32>
    %25 = arith.cmpf oeq, %21, %24 : vector<64x64xf32>
    %c64_i32_8 = arith.constant 64 : i32
    %26 = vector.broadcast %c64_i32_8 : i32 to vector<64x64xi32>
    %27 = arith.select %25, %7, %26 : vector<64x64xi1>, vector<64x64xi32>
    %cst_9 = arith.constant dense<2147483647> : vector<64xi32>
    %28 = vector.multi_reduction <minsi>, %27, %cst_9 [1] : vector<64x64xi32> to vector<64xi32>
    %29 = vector.shape_cast %28 : vector<64xi32> to vector<64x1xi32>
    %30 = vector.broadcast %29 : vector<64x1xi32> to vector<64x64xi32>
    %31 = arith.cmpi eq, %7, %30 : vector<64x64xi32>
    %32 = arith.ori %19, %31 : vector<64x64xi1>
    %cst_10 = arith.constant -3.000000e+38 : f32
    %33 = vector.broadcast %cst_10 : f32 to vector<64x64xf32>
    %34 = arith.select %31, %33, %21 : vector<64x64xi1>, vector<64x64xf32>
    %cst_11 = arith.constant dense<0xFF800000> : vector<64xf32>
    %35 = vector.multi_reduction <maximumf>, %34, %cst_11 [1] : vector<64x64xf32> to vector<64xf32>
    %36 = vector.shape_cast %35 : vector<64xf32> to vector<64x1xf32>
    %37 = vector.broadcast %36 : vector<64x1xf32> to vector<64x64xf32>
    %38 = arith.cmpf oeq, %34, %37 : vector<64x64xf32>
    %c64_i32_12 = arith.constant 64 : i32
    %39 = vector.broadcast %c64_i32_12 : i32 to vector<64x64xi32>
    %40 = arith.select %38, %7, %39 : vector<64x64xi1>, vector<64x64xi32>
    %cst_13 = arith.constant dense<2147483647> : vector<64xi32>
    %41 = vector.multi_reduction <minsi>, %40, %cst_13 [1] : vector<64x64xi32> to vector<64xi32>
    %42 = vector.shape_cast %41 : vector<64xi32> to vector<64x1xi32>
    %43 = vector.broadcast %42 : vector<64x1xi32> to vector<64x64xi32>
    %44 = arith.cmpi eq, %7, %43 : vector<64x64xi32>
    %45 = arith.ori %32, %44 : vector<64x64xi1>
    %cst_14 = arith.constant -3.000000e+38 : f32
    %46 = vector.broadcast %cst_14 : f32 to vector<64x64xf32>
    %47 = arith.select %44, %46, %34 : vector<64x64xi1>, vector<64x64xf32>
    %cst_15 = arith.constant dense<0xFF800000> : vector<64xf32>
    %48 = vector.multi_reduction <maximumf>, %47, %cst_15 [1] : vector<64x64xf32> to vector<64xf32>
    %49 = vector.shape_cast %48 : vector<64xf32> to vector<64x1xf32>
    %50 = vector.broadcast %49 : vector<64x1xf32> to vector<64x64xf32>
    %51 = arith.cmpf oeq, %47, %50 : vector<64x64xf32>
    %c64_i32_16 = arith.constant 64 : i32
    %52 = vector.broadcast %c64_i32_16 : i32 to vector<64x64xi32>
    %53 = arith.select %51, %7, %52 : vector<64x64xi1>, vector<64x64xi32>
    %cst_17 = arith.constant dense<2147483647> : vector<64xi32>
    %54 = vector.multi_reduction <minsi>, %53, %cst_17 [1] : vector<64x64xi32> to vector<64xi32>
    %55 = vector.shape_cast %54 : vector<64xi32> to vector<64x1xi32>
    %56 = vector.broadcast %55 : vector<64x1xi32> to vector<64x64xi32>
    %57 = arith.cmpi eq, %7, %56 : vector<64x64xi32>
    %58 = arith.ori %45, %57 : vector<64x64xi1>
    %cst_18 = arith.constant -3.000000e+38 : f32
    %59 = vector.broadcast %cst_18 : f32 to vector<64x64xf32>
    %60 = arith.select %57, %59, %47 : vector<64x64xi1>, vector<64x64xf32>
    %cst_19 = arith.constant dense<0xFF800000> : vector<64xf32>
    %61 = vector.multi_reduction <maximumf>, %60, %cst_19 [1] : vector<64x64xf32> to vector<64xf32>
    %62 = vector.shape_cast %61 : vector<64xf32> to vector<64x1xf32>
    %63 = vector.broadcast %62 : vector<64x1xf32> to vector<64x64xf32>
    %64 = arith.cmpf oeq, %60, %63 : vector<64x64xf32>
    %c64_i32_20 = arith.constant 64 : i32
    %65 = vector.broadcast %c64_i32_20 : i32 to vector<64x64xi32>
    %66 = arith.select %64, %7, %65 : vector<64x64xi1>, vector<64x64xi32>
    %cst_21 = arith.constant dense<2147483647> : vector<64xi32>
    %67 = vector.multi_reduction <minsi>, %66, %cst_21 [1] : vector<64x64xi32> to vector<64xi32>
    %68 = vector.shape_cast %67 : vector<64xi32> to vector<64x1xi32>
    %69 = vector.broadcast %68 : vector<64x1xi32> to vector<64x64xi32>
    %70 = arith.cmpi eq, %7, %69 : vector<64x64xi32>
    %71 = arith.ori %58, %70 : vector<64x64xi1>
    %cst_22 = arith.constant -3.000000e+38 : f32
    %72 = vector.broadcast %cst_22 : f32 to vector<64x64xf32>
    %73 = arith.select %70, %72, %60 : vector<64x64xi1>, vector<64x64xf32>
    %cst_23 = arith.constant dense<0xFF800000> : vector<64xf32>
    %74 = vector.multi_reduction <maximumf>, %73, %cst_23 [1] : vector<64x64xf32> to vector<64xf32>
    %75 = vector.shape_cast %74 : vector<64xf32> to vector<64x1xf32>
    %76 = vector.broadcast %75 : vector<64x1xf32> to vector<64x64xf32>
    %77 = arith.cmpf oeq, %73, %76 : vector<64x64xf32>
    %c64_i32_24 = arith.constant 64 : i32
    %78 = vector.broadcast %c64_i32_24 : i32 to vector<64x64xi32>
    %79 = arith.select %77, %7, %78 : vector<64x64xi1>, vector<64x64xi32>
    %cst_25 = arith.constant dense<2147483647> : vector<64xi32>
    %80 = vector.multi_reduction <minsi>, %79, %cst_25 [1] : vector<64x64xi32> to vector<64xi32>
    %81 = vector.shape_cast %80 : vector<64xi32> to vector<64x1xi32>
    %82 = vector.broadcast %81 : vector<64x1xi32> to vector<64x64xi32>
    %83 = arith.cmpi eq, %7, %82 : vector<64x64xi32>
    %84 = arith.ori %71, %83 : vector<64x64xi1>
    %85 = tpu.iota {dimensions = array<i32: 0>} : vector<64x1xi32>
    %86 = vector.broadcast %2 : i32 to vector<64x1xi32>
    %87 = arith.addi %85, %86 : vector<64x1xi32>
    %88 = vector.broadcast %87 : vector<64x1xi32> to vector<64x64xi32>
    %89 = arith.cmpi ne, %7, %88 : vector<64x64xi32>
    %90 = arith.andi %84, %89 : vector<64x64xi1>
    %cst_26 = arith.constant 0.000000e+00 : f32
    %91 = vector.broadcast %cst_26 : f32 to vector<64x64xf32>
    %92 = arith.select %90, %6, %91 : vector<64x64xi1>, vector<64x64xf32>
    %cst_27 = arith.constant dense<0.000000e+00> : vector<64xf32>
    %93 = vector.multi_reduction <add>, %92, %cst_27 [1] : vector<64x64xf32> to vector<64xf32>
    %94 = vector.shape_cast %93 : vector<64xf32> to vector<64x1xf32>
    %cst_28 = arith.constant 9.99999997E-7 : f32
    %95 = vector.broadcast %cst_28 : f32 to vector<64x1xf32>
    %96 = arith.addf %94, %95 : vector<64x1xf32>
    %97 = vector.broadcast %96 : vector<64x1xf32> to vector<64x64xf32>
    %98 = arith.divf %92, %97 : vector<64x64xf32>
    %c0_29 = arith.constant 0 : index
    %c0_30 = arith.constant 0 : index
    %99 = vector.load %arg3[%c0_29, %c0_30] : memref<64x64xf32, #tpu.memory_space<vmem>>, vector<64x64xf32>
    %100 = vector.broadcast %0 : f32 to vector<64x64xf32>
    %101 = arith.mulf %100, %99 : vector<64x64xf32>
    %cst_31 = arith.constant 1.000000e+00 : f32
    %102 = arith.subf %cst_31, %0 : f32
    %103 = vector.broadcast %102 : f32 to vector<64x64xf32>
    %104 = arith.mulf %103, %98 : vector<64x64xf32>
    %105 = arith.addf %101, %104 : vector<64x64xf32>
    %c0_32 = arith.constant 0 : index
    %c0_33 = arith.constant 0 : index
    %106 = vector.load %arg5[%c0_32, %c0_33] : memref<64x64xf32, #tpu.memory_space<vmem>>, vector<64x64xf32>
    tpu.vector_store %arg5[%c0_32, %c0_33], %98 {strides = array<i32>} : memref<64x64xf32, #tpu.memory_space<vmem>>, vector<64x64xf32>,
    %c0_34 = arith.constant 0 : index
    %c0_35 = arith.constant 0 : index
    %107 = vector.load %arg4[%c0_34, %c0_35] : memref<64x64xf32, #tpu.memory_space<vmem>>, vector<64x64xf32>
    tpu.vector_store %arg4[%c0_34, %c0_35], %105 {strides = array<i32>} : memref<64x64xf32, #tpu.memory_space<vmem>>, vector<64x64xf32>,
    return
  }
  func.func @transform_0(%arg0: i32) -> i32 {
    %c0_i32 = arith.constant 0 : i32
    %c0_i32_0 = arith.constant 0 : i32
    return %c0_i32 : i32
  }
  func.func @transform_1(%arg0: i32) -> (i32, i32) {
    %c0_i32 = arith.constant 0 : i32
    %c0_i32_0 = arith.constant 0 : i32
    %c0_i32_1 = arith.constant 0 : i32
    return %c0_i32, %c0_i32_0 : i32, i32
  }
  func.func @transform_2(%arg0: i32) -> (i32, i32) {
    %c0_i32 = arith.constant 0 : i32
    %c0_i32_0 = arith.constant 0 : i32
    return %arg0, %c0_i32 : i32, i32
  }
  func.func @transform_3(%arg0: i32) -> (i32, i32) {
    %c0_i32 = arith.constant 0 : i32
    %c0_i32_0 = arith.constant 0 : i32
    return %arg0, %c0_i32 : i32, i32
  }
  func.func @transform_4(%arg0: i32) -> (i32, i32) {
    %c0_i32 = arith.constant 0 : i32
    %c0_i32_0 = arith.constant 0 : i32
    return %arg0, %c0_i32 : i32, i32
  }
}

</mosaic_0001>

<bundles_post_ra>
// kernel: tpu_custom_call.1
= control target key start
LH: loop header
LB: loop body
LE: loop exit
PB: predicated region body
PF: predicated region fallthrough
CT: control target
= control target key end

     0   :  { %11 = vsyncpa [#allocation4], 0  ;;  %s2658_s0 = inlined_call_operand.<no memory space> [shape: f32[1], index: 0, kind: input, shape index: {}]   ;;  %s2659_s1 = inlined_call_operand.hbm [shape: f32[64,32], index: 1, kind: input, shape index: {}]   ;;  %s2660_s2 = inlined_call_operand.hbm [shape: f32[64,64], index: 2, kind: input, shape index: {}]   ;;  %s2661_s3 = inlined_call_operand.hbm [shape: f32[64,64], index: 3, kind: output, shape index: {0}]   ;;  %s2662_s4 = inlined_call_operand.hbm [shape: f32[64,64], index: 4, kind: output, shape index: {1}]  }
   0x1   :  { %12 = vsyncpa [#allocation7], 0 }
   0x2   :  { %13 = vsyncpa [#allocation5], 0 }
   0x3   :  { %14 = vsyncpa [#allocation10], 0  ;;  %s1696_s15 = smov [#allocation3]   ;;  %s1600_s19 = scalar_lea.hbm %s2659_s1, 1024 }
   0x4   :  { %s22_s16 = sshll.u32 %s1696_s15, 4  ;;  %p1601_p0 = scmp.ne.s32.totalorder %s2659_s1, %s1600_s19  ;;  %s23_s16 = int_to_ptr.vmem [resolvable:$true] %s22_s16 }
   0x5   :  { %p1604_p1 = scmp.lt.u32.totalorder %s1600_s19, %s2659_s1 }
   0x7   :  { %p1606_p2 = pnand %p1604_p1, %p1601_p0 }
   0x9   :  { %1609 = shalt.err (!%p1606_p2)
}
   0xa   :  { %s1610_s24 = scalar_lea.vmem %s23_s16, 1024  ;;  %p1615_p4 = scmp.lt.s32.totalorder %s23_s16, %s23_s16 }
   0xb   :  { %p1611_p3 = scmp.ne.s32.totalorder %s23_s16, %s1610_s24  ;;  %p1616_p5 = scmp.lt.s32.totalorder %s1610_s24, %s1610_s24 }
   0xd   :  { %p1617_p6 = por %p1616_p5, %p1615_p4 }
   0xf   :  { %p1618_p7 = pnand %p1617_p6, %p1611_p3 }
  0x11   :  { %1621 = shalt.err (!%p1618_p7)
}
  0x12   :  { %s1697_s25 = smov 128   ;;  %s1698_s26 = smov 8  }
  0x13   :  { %28 = dma.hbm_to_vmem [thread:$0]  %s2659_s1, 1024, %s23_s16, [#allocation4], %s1697_s25, %s1697_s25, %s1698_s26  }
  0x14   :  { %s1699_s29 = smov [#allocation6]   ;;  %s1622_s7 = scalar_lea.hbm %s2660_s2, 1024 }
  0x15   :  { %s34_s30 = sshll.u32 %s1699_s29, 4  ;;  %p1623_p8 = scmp.ne.s32.totalorder %s2660_s2, %s1622_s7  ;;  %s35_s30 = int_to_ptr.vmem [resolvable:$true] %s34_s30 }
  0x16   :  { %p1626_p9 = scmp.lt.u32.totalorder %s1622_s7, %s2660_s2 }
  0x18   :  { %p1628_p10 = pnand %p1626_p9, %p1623_p8 }
  0x1a   :  { %1631 = shalt.err (!%p1628_p10)
}
  0x1b   :  { %s1632_s12 = scalar_lea.vmem %s35_s30, 1024  ;;  %p1637_p12 = scmp.lt.s32.totalorder %s35_s30, %s35_s30 }
  0x1c   :  { %p1633_p11 = scmp.ne.s32.totalorder %s35_s30, %s1632_s12  ;;  %p1638_p13 = scmp.lt.s32.totalorder %s1632_s12, %s1632_s12 }
  0x1e   :  { %p1639_p0 = por %p1638_p13, %p1637_p12 }
  0x20   :  { %p1640_p1 = pnand %p1639_p0, %p1633_p11 }
  0x22   :  { %1643 = shalt.err (!%p1640_p1)
}
  0x23   :  { %40 = dma.hbm_to_vmem [thread:$0]  %s2660_s2, 1024, %s35_s30, [#allocation7], %s1697_s25, %s1697_s25, %s1698_s26  }
  0x24   :  { %1688 = dma.done.wait [#allocation4], 1024  }
  0x25   :  { %1689 = vsyncadd [#allocation4], 4294966272 }
  0x26   :  { %1690 = dma.done.wait [#allocation7], 1024  }
  0x27   :  { %1691 = vsyncadd [#allocation7], 4294966272  ;;  %vm66_vm0 = vcmask 261120   ;;  %v49_v1 = vld [vmem:[#allocation3] sm:$0xff]  ;;  %v50_v2 = vld [vmem:[#allocation3 + $0x8] sm:$0xff]  ;;  %vm222_vm2 = vcmask 523264   ;;  %v2668_v29 = vlaneseq }
  0x28   :  { %vm1759_vm1 = vmpackc.low %vm66_vm0, %vm66_vm0  ;;  %v51_v3 = vld [vmem:[#allocation3 + $0x10] sm:$0xff]  ;;  %v1546_v4 = vpack.c.bf16 %v50_v2, %v49_v1  ;;  %v52_v5 = vld [vmem:[#allocation3 + $0x18] sm:$0xff]  ;;  %1534 = vmatprep.mubr.msk.f32.mxu0 %vm66_vm0, %v49_v1  ;;  %s1418_s15 = ssub.f32 1.0, %s2658_s0  ;;  %s1701_s19 = smov [#allocation8]  }
  0x29   :  { %v53_v6 = vld [vmem:[#allocation3 + $0x20] sm:$0xff]  ;;  %v1552_v7 = vpack.c.bf16 %v52_v5, %v51_v3  ;;  %v54_v8 = vld [vmem:[#allocation3 + $0x28] sm:$0xff]  ;;  %v55_v10 = vld [vmem:[#allocation3 + $0x30] sm:$0xff]  ;;  %v1836_v30 = vand.u32 127, %v2668_v29  ;;  %s1457_s20 = sshll.u32 %s1701_s19, 4  ;;  %s1458_s20 = int_to_ptr.vmem [resolvable:$true] %s1457_s20 }
  0x2a   :  { %1540 = vmatprep.mubr.msk.f32.mxu1 %vm66_vm0, %v53_v6  ;;  %1548 = vmatprep.subr.msk.bf16.mxu0 %vm1759_vm1, %v1546_v4  ;;  %v1558_v9 = vpack.c.bf16 %v54_v8, %v53_v6  ;;  %v56_v11 = vld [vmem:[#allocation3 + $0x38] sm:$0xff] }
  0x2b   :  { %1570 = vmatprep.subr.msk.bf16.mxu1 %vm1759_vm1, %v1546_v4  ;;  %1551 = vmatpush3.bf16.xpose.msk.msra.mxu0 %vm1759_vm1, %v1546_v4  ;;  %v1564_v12 = vpack.c.bf16 %v56_v11, %v55_v10 }
  0x2c   :  { %1574 = vmatpush3.bf16.xpose.msk.msra.mxu1 %vm1759_vm1, %v1546_v4  ;;  %1554 = vmatprep.subr.msk.bf16.mxu0 %vm1759_vm1, %v1552_v7 }
  0x2d   :  { %1571 = vmatprep.subr.msk.bf16.mxu1 %vm1759_vm1, %v1552_v7 }
  0x33   :  { %1557 = vmatpush3.bf16.xpose.msk.msra.mxu0 %vm1759_vm1, %v1552_v7 }
  0x34   :  { %1575 = vmatpush3.bf16.xpose.msk.msra.mxu1 %vm1759_vm1, %v1552_v7  ;;  %1560 = vmatprep.subr.msk.bf16.mxu0 %vm1759_vm1, %v1558_v9 }
  0x35   :  { %1572 = vmatprep.subr.msk.bf16.mxu1 %vm1759_vm1, %v1558_v9 }
  0x3b   :  { %1563 = vmatpush3.bf16.xpose.msk.msra.mxu0 %vm1759_vm1, %v1558_v9 }
  0x3c   :  { %1576 = vmatpush3.bf16.xpose.msk.msra.mxu1 %vm1759_vm1, %v1558_v9  ;;  %1566 = vmatprep.subr.msk.bf16.mxu0 %vm1759_vm1, %v1564_v12 }
  0x3d   :  { %1573 = vmatprep.subr.msk.bf16.mxu1 %vm1759_vm1, %v1564_v12 }
  0x43   :  { %1569 = vmatpush3.bf16.xpose.msk.msra.mxu0 %vm1759_vm1, %v1564_v12 }
  0x44   :  { %1577 = vmatpush3.bf16.xpose.msk.msra.mxu1 %vm1759_vm1, %v1564_v12 }
  0x4a   :  { %1535 = vmatmul.mubr.msk.f32.vlgmr.msra.gmra.mrb[0].mxu0 %vm66_vm0, %v50_v2 }
  0x4b   :  { %1541 = vmatmul.mubr.msk.f32.vlgmr.msra.gmra.mrb[0].mxu1 %vm66_vm0, %v54_v8  ;;  %1537 = vmatprep.mubr.msk.f32.mxu0 %vm66_vm0, %v51_v3 }
  0x4c   :  { %1543 = vmatprep.mubr.msk.f32.mxu1 %vm66_vm0, %v55_v10 }
  0x4e   :  { %1538 = vmatmul.mubr.msk.f32.gmra.mrb[2].mxu0 %vm66_vm0, %v52_v5 }
  0x4f   :  { %1544 = vmatmul.mubr.msk.f32.gmra.mrb[2].mxu1 %vm66_vm0, %v56_v11 }
 0x11d   :  { %v1803_v13 = vpop.f32.mrb[0].mxu0 }
 0x11e   :  { %v1805_v14 = vpop.f32.mrb[0].mxu1  ;;  %v1807_v15 = vpop.f32.mrb[1].mxu0  ;;  %v226_v17 = vsel %vm222_vm2, %v1803_v13, -inf }
 0x11f   :  { %v238_v16 = vsel %vm222_vm2, %v1805_v14, -inf  ;;  %v1813_v18 = vpop.f32.mrb[1].mxu1  ;;  %227 = vmax.xlane.f32.xlu0 %v226_v17  ;;  %v223_v21 = vsel %vm222_vm2, %v1807_v15, -inf }
 0x120   :  { %239 = vmax.xlane.f32.xlu1 %v238_v16  ;;  %v235_v26 = vsel %vm222_vm2, %v1813_v18, -inf }
 0x121   :  { %v1815_v19 = vpop.f32.mrb[2].mxu0 }
 0x122   :  { %v1817_v20 = vpop.f32.mrb[2].mxu1  ;;  %v232_v22 = vsel %vm222_vm2, %v1815_v19, -inf  ;;  %v1823_v23 = vpop.f32.mrb[3].mxu0 }
 0x123   :  { %v1825_v24 = vpop.f32.mrb[3].mxu1  ;;  %224 = vmax.xlane.f32.xlu0 %v223_v21  ;;  %v229_v25 = vsel %vm222_vm2, %v1823_v23, -inf  ;;  %v244_v28 = vsel %vm222_vm2, %v1817_v20, -inf }
 0x124   :  { %233 = vmax.xlane.f32.xlu1 %v232_v22  ;;  %v241_v27 = vsel %vm222_vm2, %v1825_v24, -inf }
 0x127   :  { %236 = vmax.xlane.f32.xlu0 %v235_v26 }
 0x128   :  { %230 = vmax.xlane.f32.xlu1 %v229_v25 }
 0x12b   :  { %242 = vmax.xlane.f32.xlu0 %v241_v27 }
 0x12c   :  { %245 = vmax.xlane.f32.xlu1 %v244_v28 }
 0x1ac   :  { %v228_v32 = vpop.xlane.xlu0 %227 }
 0x1ad   :  { %v240_v31 = vpop.xlane.xlu1 %239  ;;  %vm248_vm4 = vcmp.eq.f32.partialorder %v1803_v13, %v228_v32 }
 0x1ae   :  { %vm252_vm3 = vcmp.eq.f32.partialorder %v1805_v14, %v240_v31  ;;  %v256_v34 = vsel %vm248_vm4, %v1836_v30, 64 }
 0x1af   :  { %v260_v33 = vsel %vm252_vm3, %v1836_v30, 64  ;;  %v278_v35 = vsel %vm222_vm2, %v256_v34, 2147483647 }
 0x1b0   :  { %v338_v36 = vsel %vm222_vm2, %v260_v33, 2147483647  ;;  %v225_v37 = vpop.xlane.xlu0 %224  ;;  %v280_v39 = vshra.s32 %v278_v35, 16  ;;  %v279_v7 = vand.u32 65535, %v278_v35 }
 0x1b1   :  { %v234_v38 = vpop.xlane.xlu1 %233  ;;  %vm247_vm5 = vcmp.eq.f32.partialorder %v1807_v15, %v225_v37  ;;  %v340_v43 = vshra.s32 %v338_v36, 16  ;;  %v339_v11 = vand.u32 65535, %v338_v36 }
 0x1b2   :  { %vm250_vm6 = vcmp.eq.f32.partialorder %v1815_v19, %v234_v38  ;;  %v255_v40 = vsel %vm247_vm5, %v1836_v30, 64  ;;  %v282_v42 = vcvt.s32.f32 %v280_v39  ;;  %v281_v9 = vcvt.s32.f32 %v279_v7 }
 0x1b3   :  { %v258_v41 = vsel %vm250_vm6, %v1836_v30, 64  ;;  %v263_v44 = vsel %vm222_vm2, %v255_v40, 2147483647  ;;  %v342_v53 = vcvt.s32.f32 %v340_v43  ;;  %v341_v22 = vcvt.s32.f32 %v339_v11 }
 0x1b4   :  { %v308_v45 = vsel %vm222_vm2, %v258_v41, 2147483647  ;;  %v237_v46 = vpop.xlane.xlu0 %236  ;;  %283 = vmin.xlane.f32.xlu1 %v282_v42  ;;  %v265_v48 = vshra.s32 %v263_v44, 16  ;;  %v264_v10 = vand.u32 65535, %v263_v44 }
 0x1b5   :  { %v231_v47 = vpop.xlane.xlu1 %230  ;;  %vm251_vm7 = vcmp.eq.f32.partialorder %v1813_v18, %v237_v46  ;;  %v310_v49 = vshra.s32 %v308_v45, 16  ;;  %v309_v26 = vand.u32 65535, %v308_v45 }
 0x1b6   :  { %vm249_vm8 = vcmp.eq.f32.partialorder %v1823_v23, %v231_v47  ;;  %v259_v50 = vsel %vm251_vm7, %v1836_v30, 64  ;;  %v267_v52 = vcvt.s32.f32 %v265_v48  ;;  %v266_v21 = vcvt.s32.f32 %v264_v10 }
 0x1b7   :  { %v257_v51 = vsel %vm249_vm8, %v1836_v30, 64  ;;  %v323_v54 = vsel %vm222_vm2, %v259_v50, 2147483647  ;;  %v312_v59 = vcvt.s32.f32 %v310_v49  ;;  %v311_v34 = vcvt.s32.f32 %v309_v26 }
 0x1b8   :  { %v293_v55 = vsel %vm222_vm2, %v257_v51, 2147483647  ;;  %268 = vmin.xlane.f32.xlu0 %v267_v52  ;;  %v243_v56 = vpop.xlane.xlu0 %242  ;;  %343 = vmin.xlane.f32.xlu1 %v342_v53  ;;  %v325_v58 = vshra.s32 %v323_v54, 16  ;;  %v324_v25 = vand.u32 65535, %v323_v54 }
 0x1b9   :  { %v246_v57 = vpop.xlane.xlu1 %245  ;;  %vm253_vm9 = vcmp.eq.f32.partialorder %v1825_v24, %v243_v56  ;;  %v295_v63 = vshra.s32 %v293_v55, 16  ;;  %v294_v35 = vand.u32 65535, %v293_v55 }
 0x1ba   :  { %vm254_vm10 = vcmp.eq.f32.partialorder %v1817_v20, %v246_v57  ;;  %v261_v60 = vsel %vm253_vm9, %v1836_v30, 64  ;;  %v327_v62 = vcvt.s32.f32 %v325_v58  ;;  %v326_v33 = vcvt.s32.f32 %v324_v25 }
 0x1bb   :  { %v262_v61 = vsel %vm254_vm10, %v1836_v30, 64  ;;  %v353_v1 = vsel %vm222_vm2, %v261_v60, 2147483647  ;;  %v297_v3 = vcvt.s32.f32 %v295_v63  ;;  %v296_v41 = vcvt.s32.f32 %v294_v35 }
 0x1bc   :  { %v368_v0 = vsel %vm222_vm2, %v262_v61, 2147483647  ;;  %328 = vmin.xlane.f32.xlu0 %v327_v62  ;;  %313 = vmin.xlane.f32.xlu1 %v312_v59  ;;  %v355_v5 = vshra.s32 %v353_v1, 16  ;;  %v354_v43 = vand.u32 65535, %v353_v1 }
 0x1bd   :  { %v370_v2 = vshra.s32 %v368_v0, 16  ;;  %v369_v36 = vand.u32 65535, %v368_v0 }
 0x1be   :  { %v357_v6 = vcvt.s32.f32 %v355_v5  ;;  %v356_v47 = vcvt.s32.f32 %v354_v43 }
 0x1bf   :  { %v372_v4 = vcvt.s32.f32 %v370_v2 }
 0x1c0   :  { %298 = vmin.xlane.f32.xlu0 %v297_v3 }
 0x1c1   :  { %373 = vmin.xlane.f32.xlu1 %v372_v4 }
 0x1c4   :  { %358 = vmin.xlane.f32.xlu0 %v357_v6 }
 0x241   :  { %v284_v8 = vpop.xlane.xlu1 %283 }
 0x242   :  { %vm285_vm11 = vcmp.eq.f32.partialorder %v282_v42, %v284_v8  ;;  %v371_v42 = vcvt.s32.f32 %v369_v36  ;;  %v290_v49 = vcvt.f32.s32 %v284_v8 }
 0x243   :  { %v286_v12 = vsel %vm285_vm11, %v281_v9, inf }
 0x244   :  { %287 = vmin.xlane.f32.xlu1 %v286_v12 }
 0x245   :  { %v269_v16 = vpop.xlane.xlu0 %268  ;;  %v344_v17 = vpop.xlane.xlu1 %343 }
 0x246   :  { %vm270_vm12 = vcmp.eq.f32.partialorder %v267_v52, %v269_v16  ;;  %vm345_vm13 = vcmp.eq.f32.partialorder %v342_v53, %v344_v17  ;;  %v275_v50 = vcvt.f32.s32 %v269_v16  ;;  %v291_v52 = vshll.u32 %v290_v49, 16 }
 0x247   :  { %v271_v27 = vsel %vm270_vm12, %v266_v21, inf  ;;  %v346_v28 = vsel %vm345_vm13, %v341_v22, inf  ;;  %v350_v53 = vcvt.f32.s32 %v344_v17 }
 0x248   :  { %272 = vmin.xlane.f32.xlu0 %v271_v27  ;;  %347 = vmin.xlane.f32.xlu1 %v346_v28  ;;  %v276_v56 = vshll.u32 %v275_v50, 16 }
 0x249   :  { %v329_v31 = vpop.xlane.xlu0 %328  ;;  %v314_v32 = vpop.xlane.xlu1 %313  ;;  %v351_v61 = vshll.u32 %v350_v53, 16 }
 0x24a   :  { %vm330_vm14 = vcmp.eq.f32.partialorder %v327_v62, %v329_v31  ;;  %vm315_vm15 = vcmp.eq.f32.partialorder %v312_v59, %v314_v32  ;;  %v335_v57 = vcvt.f32.s32 %v329_v31  ;;  %v320_v58 = vcvt.f32.s32 %v314_v32 }
 0x24b   :  { %v331_v37 = vsel %vm330_vm14, %v326_v33, inf  ;;  %v316_v38 = vsel %vm315_vm15, %v311_v34, inf }
 0x24c   :  { %332 = vmin.xlane.f32.xlu0 %v331_v37  ;;  %317 = vmin.xlane.f32.xlu1 %v316_v38  ;;  %v321_v5 = vshll.u32 %v320_v58, 16 }
 0x24d   :  { %v299_v39 = vpop.xlane.xlu0 %298 }
 0x24e   :  { %v374_v40 = vpop.xlane.xlu1 %373  ;;  %vm300_vm0 = vcmp.eq.f32.partialorder %v297_v3, %v299_v39 }
 0x24f   :  { %vm375_vm1 = vcmp.eq.f32.partialorder %v372_v4, %v374_v40  ;;  %v301_v44 = vsel %vm300_vm0, %v296_v41, inf  ;;  %v336_v4 = vshll.u32 %v335_v57, 16  ;;  %v380_v7 = vcvt.f32.s32 %v374_v40 }
 0x250   :  { %v376_v45 = vsel %vm375_vm1, %v371_v42, inf  ;;  %302 = vmin.xlane.f32.xlu0 %v301_v44 }
 0x251   :  { %377 = vmin.xlane.f32.xlu1 %v376_v45  ;;  %v359_v46 = vpop.xlane.xlu0 %358  ;;  %v381_v27 = vshll.u32 %v380_v7, 16 }
 0x252   :  { %vm360_vm3 = vcmp.eq.f32.partialorder %v357_v6, %v359_v46  ;;  %v305_v6 = vcvt.f32.s32 %v299_v39  ;;  %v365_v28 = vcvt.f32.s32 %v359_v46 }
 0x253   :  { %v361_v48 = vsel %vm360_vm3, %v356_v47, inf }
 0x254   :  { %362 = vmin.xlane.f32.xlu0 %v361_v48  ;;  %v306_v26 = vshll.u32 %v305_v6, 16  ;;  %v366_v42 = vshll.u32 %v365_v28, 16 }
 0x2d1   :  { %v288_v51 = vpop.xlane.xlu1 %287 }
 0x2d2   :  { %v289_v54 = vcvt.f32.s32 %v288_v51 }
 0x2d4   :  { %v1862_v55 = vadd.s32 %v291_v52, %v289_v54 }
 0x2d5   :  { %v273_v59 = vpop.xlane.xlu0 %272  ;;  %v348_v60 = vpop.xlane.xlu1 %347 }
 0x2d6   :  { %v274_v62 = vcvt.f32.s32 %v273_v59  ;;  %v349_v63 = vcvt.f32.s32 %v348_v60  ;;  %vm384_vm4 = vcmp.eq.s32.totalorder %v1836_v30, %v1862_v55 }
 0x2d7   :  { %v1870_v0 = vsel %vm384_vm4, -3e+38, %v1803_v13 }
 0x2d8   :  { %v1872_v1 = vadd.s32 %v276_v56, %v274_v62  ;;  %v1874_v2 = vadd.s32 %v351_v61, %v349_v63  ;;  %v402_v3 = vsel %vm222_vm2, %v1870_v0, -inf }
 0x2d9   :  { %v333_v8 = vpop.xlane.xlu0 %332  ;;  %403 = vmax.xlane.f32.xlu1 %v402_v3  ;;  %v318_v9 = vpop.xlane.xlu1 %317 }
 0x2da   :  { %v334_v10 = vcvt.f32.s32 %v333_v8  ;;  %v319_v11 = vcvt.f32.s32 %v318_v9  ;;  %vm383_vm5 = vcmp.eq.s32.totalorder %v1836_v30, %v1872_v1  ;;  %vm388_vm6 = vcmp.eq.s32.totalorder %v1836_v30, %v1874_v2 }
 0x2db   :  { %v1886_v12 = vsel %vm383_vm5, -3e+38, %v1807_v15  ;;  %v1892_v16 = vsel %vm388_vm6, -3e+38, %v1805_v14 }
 0x2dc   :  { %v1894_v17 = vadd.s32 %v336_v4, %v334_v10  ;;  %v1896_v21 = vadd.s32 %v321_v5, %v319_v11  ;;  %v399_v22 = vsel %vm222_vm2, %v1886_v12, -inf  ;;  %v414_v25 = vsel %vm222_vm2, %v1892_v16, -inf }
 0x2dd   :  { %400 = vmax.xlane.f32.xlu0 %v399_v22  ;;  %v303_v31 = vpop.xlane.xlu0 %302  ;;  %415 = vmax.xlane.f32.xlu1 %v414_v25 }
 0x2de   :  { %v378_v32 = vpop.xlane.xlu1 %377  ;;  %v304_v33 = vcvt.f32.s32 %v303_v31  ;;  %vm387_vm7 = vcmp.eq.s32.totalorder %v1836_v30, %v1894_v17  ;;  %vm386_vm8 = vcmp.eq.s32.totalorder %v1836_v30, %v1896_v21 }
 0x2df   :  { %v379_v34 = vcvt.f32.s32 %v378_v32  ;;  %v1910_v35 = vsel %vm387_vm7, -3e+38, %v1813_v18  ;;  %v1916_v36 = vsel %vm386_vm8, -3e+38, %v1815_v19 }
 0x2e0   :  { %v1918_v37 = vadd.s32 %v306_v26, %v304_v33  ;;  %v411_v39 = vsel %vm222_vm2, %v1910_v35, -inf  ;;  %v408_v40 = vsel %vm222_vm2, %v1916_v36, -inf }
 0x2e1   :  { %v1920_v38 = vadd.s32 %v381_v27, %v379_v34  ;;  %412 = vmax.xlane.f32.xlu0 %v411_v39  ;;  %v363_v41 = vpop.xlane.xlu0 %362  ;;  %409 = vmax.xlane.f32.xlu1 %v408_v40 }
 0x2e2   :  { %v364_v43 = vcvt.f32.s32 %v363_v41  ;;  %vm2666_vm9 = vcmp.eq.s32.totalorder %v1836_v30, %v1918_v37 }
 0x2e3   :  { %vm2664_vm10 = vcmp.eq.s32.totalorder %v1836_v30, %v1920_v38  ;;  %v1934_v44 = vsel %vm2666_vm9, -3e+38, %v1823_v23 }
 0x2e4   :  { %v1940_v45 = vsel %vm2664_vm10, -3e+38, %v1817_v20  ;;  %v1942_v46 = vadd.s32 %v366_v42, %v364_v43  ;;  %v405_v47 = vsel %vm222_vm2, %v1934_v44, -inf }
 0x2e5   :  { %v420_v48 = vsel %vm222_vm2, %v1940_v45, -inf  ;;  %406 = vmax.xlane.f32.xlu0 %v405_v47 }
 0x2e6   :  { %421 = vmax.xlane.f32.xlu1 %v420_v48  ;;  %vm2663_vm11 = vcmp.eq.s32.totalorder %v1836_v30, %v1942_v46 }
 0x2e7   :  { %v1954_v49 = vsel %vm2663_vm11, -3e+38, %v1825_v24 }
 0x2e8   :  { %v417_v50 = vsel %vm222_vm2, %v1954_v49, -inf }
 0x2e9   :  { %418 = vmax.xlane.f32.xlu0 %v417_v50 }
 0x366   :  { %v404_v51 = vpop.xlane.xlu1 %403 }
 0x367   :  { %vm424_vm12 = vcmp.eq.f32.partialorder %v1870_v0, %v404_v51 }
 0x368   :  { %v432_v52 = vsel %vm424_vm12, %v1836_v30, 64 }
 0x369   :  { %v454_v53 = vsel %vm222_vm2, %v432_v52, 2147483647 }
 0x36a   :  { %v401_v54 = vpop.xlane.xlu0 %400  ;;  %v416_v56 = vpop.xlane.xlu1 %415  ;;  %v456_v57 = vshra.s32 %v454_v53, 16 }
 0x36b   :  { %vm423_vm13 = vcmp.eq.f32.partialorder %v1886_v12, %v401_v54  ;;  %vm428_vm14 = vcmp.eq.f32.partialorder %v1892_v16, %v416_v56  ;;  %v455_v54 = vand.u32 65535, %v454_v53 }
 0x36c   :  { %v431_v58 = vsel %vm423_vm13, %v1836_v30, 64  ;;  %v436_v59 = vsel %vm428_vm14, %v1836_v30, 64  ;;  %v458_v60 = vcvt.s32.f32 %v456_v57 }
 0x36d   :  { %v439_v61 = vsel %vm222_vm2, %v431_v58, 2147483647  ;;  %v514_v62 = vsel %vm222_vm2, %v436_v59, 2147483647  ;;  %v457_v57 = vcvt.s32.f32 %v455_v54 }
 0x36e   :  { %v413_v63 = vpop.xlane.xlu0 %412  ;;  %459 = vmin.xlane.f32.xlu1 %v458_v60  ;;  %v410_v3 = vpop.xlane.xlu1 %409  ;;  %v441_v4 = vshra.s32 %v439_v61, 16  ;;  %v516_v5 = vshra.s32 %v514_v62, 16  ;;  %v440_v58 = vand.u32 65535, %v439_v61  ;;  %v515_v59 = vand.u32 65535, %v514_v62 }
 0x36f   :  { %vm427_vm15 = vcmp.eq.f32.partialorder %v1910_v35, %v413_v63  ;;  %vm426_vm0 = vcmp.eq.f32.partialorder %v1916_v36, %v410_v3 }
 0x370   :  { %v435_v6 = vsel %vm427_vm15, %v1836_v30, 64  ;;  %v434_v7 = vsel %vm426_vm0, %v1836_v30, 64  ;;  %v443_v8 = vcvt.s32.f32 %v441_v4  ;;  %v518_v9 = vcvt.s32.f32 %v516_v5 }
 0x371   :  { %v499_v10 = vsel %vm222_vm2, %v435_v6, 2147483647  ;;  %v484_v11 = vsel %vm222_vm2, %v434_v7, 2147483647  ;;  %v442_v5 = vcvt.s32.f32 %v440_v58  ;;  %v517_v6 = vcvt.s32.f32 %v515_v59 }
 0x372   :  { %444 = vmin.xlane.f32.xlu0 %v443_v8  ;;  %v407_v22 = vpop.xlane.xlu0 %406  ;;  %519 = vmin.xlane.f32.xlu1 %v518_v9  ;;  %v501_v26 = vshra.s32 %v499_v10, 16  ;;  %v486_v27 = vshra.s32 %v484_v11, 16  ;;  %v500_v7 = vand.u32 65535, %v499_v10 }
 0x373   :  { %v422_v25 = vpop.xlane.xlu1 %421  ;;  %vm425_vm1 = vcmp.eq.f32.partialorder %v1934_v44, %v407_v22  ;;  %v485_v22 = vand.u32 65535, %v484_v11 }
 0x374   :  { %vm430_vm3 = vcmp.eq.f32.partialorder %v1940_v45, %v422_v25  ;;  %v433_v28 = vsel %vm425_vm1, %v1836_v30, 64  ;;  %v503_v32 = vcvt.s32.f32 %v501_v26  ;;  %v488_v33 = vcvt.s32.f32 %v486_v27 }
 0x375   :  { %v438_v31 = vsel %vm430_vm3, %v1836_v30, 64  ;;  %v469_v34 = vsel %vm222_vm2, %v433_v28, 2147483647  ;;  %v502_v28 = vcvt.s32.f32 %v500_v7  ;;  %v487_v61 = vcvt.s32.f32 %v485_v22 }
 0x376   :  { %v544_v39 = vsel %vm222_vm2, %v438_v31, 2147483647  ;;  %504 = vmin.xlane.f32.xlu0 %v503_v32  ;;  %v419_v40 = vpop.xlane.xlu0 %418  ;;  %489 = vmin.xlane.f32.xlu1 %v488_v33  ;;  %v471_v41 = vshra.s32 %v469_v34, 16  ;;  %v470_v62 = vand.u32 65535, %v469_v34 }
 0x377   :  { %v546_v42 = vshra.s32 %v544_v39, 16  ;;  %vm429_vm12 = vcmp.eq.f32.partialorder %v1954_v49, %v419_v40 }
 0x378   :  { %v437_v43 = vsel %vm429_vm12, %v1836_v30, 64  ;;  %v473_v47 = vcvt.s32.f32 %v471_v41 }
 0x379   :  { %v548_v48 = vcvt.s32.f32 %v546_v42  ;;  %v529_v50 = vsel %vm222_vm2, %v437_v43, 2147483647 }
 0x37a   :  { %474 = vmin.xlane.f32.xlu0 %v473_v47  ;;  %v531_v51 = vshra.s32 %v529_v50, 16  ;;  %v530_v41 = vand.u32 65535, %v529_v50 }
 0x37b   :  { %549 = vmin.xlane.f32.xlu1 %v548_v48 }
 0x37c   :  { %v533_v52 = vcvt.s32.f32 %v531_v51  ;;  %v532_v34 = vcvt.s32.f32 %v530_v41 }
 0x37e   :  { %534 = vmin.xlane.f32.xlu0 %v533_v52 }
 0x3fb   :  { %v460_v56 = vpop.xlane.xlu1 %459 }
 0x3fc   :  { %vm461_vm13 = vcmp.eq.f32.partialorder %v458_v60, %v460_v56  ;;  %v545_v60 = vand.u32 65535, %v544_v39 }
 0x3fd   :  { %v462_v63 = vsel %vm461_vm13, %v457_v57, inf }
 0x3fe   :  { %463 = vmin.xlane.f32.xlu1 %v462_v63 }
 0x3ff   :  { %v445_v3 = vpop.xlane.xlu0 %444  ;;  %v520_v4 = vpop.xlane.xlu1 %519 }
 0x400   :  { %vm446_vm14 = vcmp.eq.f32.partialorder %v443_v8, %v445_v3  ;;  %vm521_vm15 = vcmp.eq.f32.partialorder %v518_v9, %v520_v4  ;;  %v472_v8 = vcvt.s32.f32 %v470_v62  ;;  %v547_v9 = vcvt.s32.f32 %v545_v60 }
 0x401   :  { %v447_v25 = vsel %vm446_vm14, %v442_v5, inf  ;;  %v522_v26 = vsel %vm521_vm15, %v517_v6, inf  ;;  %v451_v39 = vcvt.f32.s32 %v445_v3  ;;  %v526_v58 = vcvt.f32.s32 %v520_v4 }
 0x402   :  { %448 = vmin.xlane.f32.xlu0 %v447_v25  ;;  %523 = vmin.xlane.f32.xlu1 %v522_v26 }
 0x403   :  { %v505_v53 = vpop.xlane.xlu0 %504  ;;  %v490_v27 = vpop.xlane.xlu1 %489  ;;  %v452_v50 = vshll.u32 %v451_v39, 16  ;;  %v527_v7 = vshll.u32 %v526_v58, 16 }
 0x404   :  { %vm506_vm0 = vcmp.eq.f32.partialorder %v503_v32, %v505_v53  ;;  %vm491_vm1 = vcmp.eq.f32.partialorder %v488_v33, %v490_v27  ;;  %v466_v33 = vcvt.f32.s32 %v460_v56 }
 0x405   :  { %v507_v31 = vsel %vm506_vm0, %v502_v28, inf  ;;  %v492_v40 = vsel %vm491_vm1, %v487_v61, inf }
 0x406   :  { %508 = vmin.xlane.f32.xlu0 %v507_v31  ;;  %493 = vmin.xlane.f32.xlu1 %v492_v40  ;;  %v467_v57 = vshll.u32 %v466_v33, 16 }
 0x407   :  { %v475_v10 = vpop.xlane.xlu0 %474 }
 0x408   :  { %v550_v11 = vpop.xlane.xlu1 %549  ;;  %vm476_vm3 = vcmp.eq.f32.partialorder %v473_v47, %v475_v10  ;;  %v511_v47 = vcvt.f32.s32 %v505_v53 }
 0x409   :  { %vm551_vm12 = vcmp.eq.f32.partialorder %v548_v48, %v550_v11  ;;  %v477_v42 = vsel %vm476_vm3, %v472_v8, inf  ;;  %v496_v48 = vcvt.f32.s32 %v490_v27  ;;  %v481_v27 = vcvt.f32.s32 %v475_v10 }
 0x40a   :  { %v552_v43 = vsel %vm551_vm12, %v547_v9, inf  ;;  %478 = vmin.xlane.f32.xlu0 %v477_v42  ;;  %v512_v26 = vshll.u32 %v511_v47, 16  ;;  %v556_v28 = vcvt.f32.s32 %v550_v11 }
 0x40b   :  { %553 = vmin.xlane.f32.xlu1 %v552_v43  ;;  %v535_v51 = vpop.xlane.xlu0 %534  ;;  %v497_v53 = vshll.u32 %v496_v48, 16  ;;  %v482_v41 = vshll.u32 %v481_v27, 16 }
 0x40c   :  { %vm536_vm13 = vcmp.eq.f32.partialorder %v533_v52, %v535_v51  ;;  %v557_v42 = vshll.u32 %v556_v28, 16 }
 0x40d   :  { %v537_v32 = vsel %vm536_vm13, %v532_v34, inf }
 0x40e   :  { %538 = vmin.xlane.f32.xlu0 %v537_v32 }
 0x48b   :  { %v464_v54 = vpop.xlane.xlu1 %463 }
 0x48c   :  { %v465_v59 = vcvt.f32.s32 %v464_v54 }
 0x48e   :  { %v1982_v63 = vadd.s32 %v467_v57, %v465_v59 }
 0x48f   :  { %v449_v5 = vpop.xlane.xlu0 %448  ;;  %v524_v6 = vpop.xlane.xlu1 %523 }
 0x490   :  { %v450_v22 = vcvt.f32.s32 %v449_v5  ;;  %v525_v25 = vcvt.f32.s32 %v524_v6  ;;  %vm560_vm14 = vcmp.eq.s32.totalorder %v1836_v30, %v1982_v63 }
 0x491   :  { %v1990_v52 = vsel %vm560_vm14, -3e+38, %v1870_v0 }
 0x492   :  { %v1992_v56 = vadd.s32 %v452_v50, %v450_v22  ;;  %v1994_v3 = vadd.s32 %v527_v7, %v525_v25  ;;  %v586_v4 = vsel %vm222_vm2, %v1990_v52, -inf }
 0x493   :  { %v509_v61 = vpop.xlane.xlu0 %508  ;;  %587 = vmax.xlane.f32.xlu1 %v586_v4  ;;  %v494_v62 = vpop.xlane.xlu1 %493 }
 0x494   :  { %v510_v60 = vcvt.f32.s32 %v509_v61  ;;  %v495_v31 = vcvt.f32.s32 %v494_v62  ;;  %vm559_vm15 = vcmp.eq.s32.totalorder %v1836_v30, %v1992_v56  ;;  %vm564_vm0 = vcmp.eq.s32.totalorder %v1836_v30, %v1994_v3 }
 0x495   :  { %v2006_v0 = vsel %vm559_vm15, -3e+38, %v1886_v12  ;;  %v2012_v40 = vsel %vm564_vm0, -3e+38, %v1892_v16  ;;  %v541_v12 = vcvt.f32.s32 %v535_v51 }
 0x496   :  { %v2014_v10 = vadd.s32 %v512_v26, %v510_v60  ;;  %v2016_v11 = vadd.s32 %v497_v53, %v495_v31  ;;  %v583_v8 = vsel %vm222_vm2, %v2006_v0, -inf  ;;  %v598_v9 = vsel %vm222_vm2, %v2012_v40, -inf }
 0x497   :  { %584 = vmax.xlane.f32.xlu0 %v583_v8  ;;  %v479_v43 = vpop.xlane.xlu0 %478  ;;  %599 = vmax.xlane.f32.xlu1 %v598_v9 }
 0x498   :  { %v554_v34 = vpop.xlane.xlu1 %553  ;;  %v480_v32 = vcvt.f32.s32 %v479_v43  ;;  %vm563_vm1 = vcmp.eq.s32.totalorder %v1836_v30, %v2014_v10  ;;  %vm562_vm3 = vcmp.eq.s32.totalorder %v1836_v30, %v2016_v11 }
 0x499   :  { %v555_v16 = vcvt.f32.s32 %v554_v34  ;;  %v2030_v33 = vsel %vm563_vm1, -3e+38, %v1910_v35  ;;  %v2036_v51 = vsel %vm562_vm3, -3e+38, %v1916_v36  ;;  %v542_v35 = vshll.u32 %v541_v12, 16 }
 0x49a   :  { %v2038_v39 = vadd.s32 %v482_v41, %v480_v32  ;;  %v595_v57 = vsel %vm222_vm2, %v2030_v33, -inf  ;;  %v592_v58 = vsel %vm222_vm2, %v2036_v51, -inf }
 0x49b   :  { %v2040_v54 = vadd.s32 %v557_v42, %v555_v16  ;;  %596 = vmax.xlane.f32.xlu0 %v595_v57  ;;  %v539_v59 = vpop.xlane.xlu0 %538  ;;  %593 = vmax.xlane.f32.xlu1 %v592_v58 }
 0x49c   :  { %v540_v50 = vcvt.f32.s32 %v539_v59  ;;  %vm2669_vm12 = vcmp.eq.s32.totalorder %v1836_v30, %v2038_v39 }
 0x49d   :  { %vm2665_vm13 = vcmp.eq.s32.totalorder %v1836_v30, %v2040_v54  ;;  %v2054_v36 = vsel %vm2669_vm12, -3e+38, %v1934_v44 }
 0x49e   :  { %v2060_v47 = vsel %vm2665_vm13, -3e+38, %v1940_v45  ;;  %v2062_v48 = vadd.s32 %v542_v35, %v540_v50  ;;  %v589_v5 = vsel %vm222_vm2, %v2054_v36, -inf }
 0x49f   :  { %v604_v6 = vsel %vm222_vm2, %v2060_v47, -inf  ;;  %590 = vmax.xlane.f32.xlu0 %v589_v5 }
 0x4a0   :  { %605 = vmax.xlane.f32.xlu1 %v604_v6  ;;  %vm2667_vm11 = vcmp.eq.s32.totalorder %v1836_v30, %v2062_v48 }
 0x4a1   :  { %v2074_v44 = vsel %vm2667_vm11, -3e+38, %v1954_v49 }
 0x4a2   :  { %v601_v45 = vsel %vm222_vm2, %v2074_v44, -inf }
 0x4a3   :  { %602 = vmax.xlane.f32.xlu0 %v601_v45 }
 0x520   :  { %v588_v7 = vpop.xlane.xlu1 %587 }
 0x521   :  { %vm608_vm10 = vcmp.eq.f32.partialorder %v1990_v52, %v588_v7 }
 0x522   :  { %v616_v22 = vsel %vm608_vm10, %v1836_v30, 64 }
 0x523   :  { %v638_v25 = vsel %vm222_vm2, %v616_v22, 2147483647 }
 0x524   :  { %v585_v4 = vpop.xlane.xlu0 %584  ;;  %v600_v26 = vpop.xlane.xlu1 %599  ;;  %v640_v53 = vshra.s32 %v638_v25, 16 }
 0x525   :  { %vm607_vm13 = vcmp.eq.f32.partialorder %v2006_v0, %v585_v4  ;;  %vm612_vm9 = vcmp.eq.f32.partialorder %v2012_v40, %v600_v26 }
 0x526   :  { %v615_v49 = vsel %vm607_vm13, %v1836_v30, 64  ;;  %v620_v27 = vsel %vm612_vm9, %v1836_v30, 64  ;;  %v642_v28 = vcvt.s32.f32 %v640_v53 }
 0x527   :  { %v623_v61 = vsel %vm222_vm2, %v615_v49, 2147483647  ;;  %v698_v62 = vsel %vm222_vm2, %v620_v27, 2147483647 }
 0x528   :  { %v597_v60 = vpop.xlane.xlu0 %596  ;;  %643 = vmin.xlane.f32.xlu1 %v642_v28  ;;  %v594_v31 = vpop.xlane.xlu1 %593  ;;  %v625_v8 = vshra.s32 %v623_v61, 16  ;;  %v700_v9 = vshra.s32 %v698_v62, 16 }
 0x529   :  { %vm611_vm10 = vcmp.eq.f32.partialorder %v2030_v33, %v597_v60  ;;  %vm610_vm11 = vcmp.eq.f32.partialorder %v2036_v51, %v594_v31 }
 0x52a   :  { %v619_v41 = vsel %vm611_vm10, %v1836_v30, 64  ;;  %v618_v42 = vsel %vm610_vm11, %v1836_v30, 64  ;;  %v627_v12 = vcvt.s32.f32 %v625_v8  ;;  %v702_v43 = vcvt.s32.f32 %v700_v9 }
 0x52b   :  { %v683_v34 = vsel %vm222_vm2, %v619_v41, 2147483647  ;;  %v668_v32 = vsel %vm222_vm2, %v618_v42, 2147483647  ;;  %v639_v9 = vand.u32 65535, %v638_v25 }
 0x52c   :  { %628 = vmin.xlane.f32.xlu0 %v627_v12  ;;  %v591_v16 = vpop.xlane.xlu0 %590  ;;  %703 = vmin.xlane.f32.xlu1 %v702_v43  ;;  %v685_v58 = vshra.s32 %v683_v34, 16  ;;  %v670_v59 = vshra.s32 %v668_v32, 16 }
 0x52d   :  { %v606_v57 = vpop.xlane.xlu1 %605  ;;  %vm609_vm9 = vcmp.eq.f32.partialorder %v2054_v36, %v591_v16  ;;  %v641_v42 = vcvt.s32.f32 %v639_v9  ;;  %v624_v16 = vand.u32 65535, %v623_v61 }
 0x52e   :  { %vm614_vm13 = vcmp.eq.f32.partialorder %v2060_v47, %v606_v57  ;;  %v617_v35 = vsel %vm609_vm9, %v1836_v30, 64  ;;  %v687_v5 = vcvt.s32.f32 %v685_v58  ;;  %v672_v6 = vcvt.s32.f32 %v670_v59 }
 0x52f   :  { %v622_v50 = vsel %vm614_vm13, %v1836_v30, 64  ;;  %v653_v7 = vsel %vm222_vm2, %v617_v35, 2147483647  ;;  %v699_v57 = vand.u32 65535, %v698_v62 }
 0x530   :  { %v728_v45 = vsel %vm222_vm2, %v622_v50, 2147483647  ;;  %688 = vmin.xlane.f32.xlu0 %v687_v5  ;;  %v603_v22 = vpop.xlane.xlu0 %602  ;;  %673 = vmin.xlane.f32.xlu1 %v672_v6  ;;  %v655_v4 = vshra.s32 %v653_v7, 16  ;;  %v626_v50 = vcvt.s32.f32 %v624_v16  ;;  %v654_v62 = vand.u32 65535, %v653_v7 }
 0x531   :  { %v730_v26 = vshra.s32 %v728_v45, 16  ;;  %vm613_vm11 = vcmp.eq.f32.partialorder %v2074_v44, %v603_v22  ;;  %v701_v22 = vcvt.s32.f32 %v699_v57 }
 0x532   :  { %v621_v53 = vsel %vm613_vm11, %v1836_v30, 64  ;;  %v657_v49 = vcvt.s32.f32 %v655_v4  ;;  %v684_v4 = vand.u32 65535, %v683_v34 }
 0x533   :  { %v732_v27 = vcvt.s32.f32 %v730_v26  ;;  %v713_v60 = vsel %vm222_vm2, %v621_v53, 2147483647  ;;  %v669_v26 = vand.u32 65535, %v668_v32 }
 0x534   :  { %658 = vmin.xlane.f32.xlu0 %v657_v49  ;;  %v715_v31 = vshra.s32 %v713_v60, 16  ;;  %v686_v9 = vcvt.s32.f32 %v684_v4  ;;  %v714_v16 = vand.u32 65535, %v713_v60 }
 0x535   :  { %733 = vmin.xlane.f32.xlu1 %v732_v27  ;;  %v671_v61 = vcvt.s32.f32 %v669_v26 }
 0x536   :  { %v717_v8 = vcvt.s32.f32 %v715_v31 }
 0x538   :  { %718 = vmin.xlane.f32.xlu0 %v717_v8 }
 0x5b5   :  { %v644_v41 = vpop.xlane.xlu1 %643 }
 0x5b6   :  { %vm645_vm10 = vcmp.eq.f32.partialorder %v642_v28, %v644_v41  ;;  %v729_v28 = vand.u32 65535, %v728_v45  ;;  %v716_v45 = vcvt.s32.f32 %v714_v16 }
 0x5b7   :  { %v646_v58 = vsel %vm645_vm10, %v641_v42, inf }
 0x5b8   :  { %647 = vmin.xlane.f32.xlu1 %v646_v58 }
 0x5b9   :  { %v629_v59 = vpop.xlane.xlu0 %628  ;;  %v704_v35 = vpop.xlane.xlu1 %703 }
 0x5ba   :  { %vm630_vm9 = vcmp.eq.f32.partialorder %v627_v12, %v629_v59  ;;  %vm705_vm13 = vcmp.eq.f32.partialorder %v702_v43, %v704_v35  ;;  %v656_v12 = vcvt.s32.f32 %v654_v62  ;;  %v731_v43 = vcvt.s32.f32 %v729_v28 }
 0x5bb   :  { %v631_v53 = vsel %vm630_vm9, %v626_v50, inf  ;;  %v706_v29 = vsel %vm705_vm13, %v701_v22, inf  ;;  %v635_v7 = vcvt.f32.s32 %v629_v59  ;;  %v710_v26 = vcvt.f32.s32 %v704_v35 }
 0x5bc   :  { %632 = vmin.xlane.f32.xlu0 %v631_v53  ;;  %707 = vmin.xlane.f32.xlu1 %v706_v29 }
 0x5bd   :  { %v689_v25 = vpop.xlane.xlu0 %688  ;;  %v674_v31 = vpop.xlane.xlu1 %673 }
 0x5be   :  { %vm690_vm11 = vcmp.eq.f32.partialorder %v687_v5, %v689_v25  ;;  %vm675_vm10 = vcmp.eq.f32.partialorder %v672_v6, %v674_v31  ;;  %v650_v6 = vcvt.f32.s32 %v644_v41 }
 0x5bf   :  { %v691_v42 = vsel %vm690_vm11, %v686_v9, inf  ;;  %v676_v58 = vsel %vm675_vm10, %v671_v61, inf  ;;  %v680_v9 = vcvt.f32.s32 %v674_v31 }
 0x5c0   :  { %692 = vmin.xlane.f32.xlu0 %v691_v42  ;;  %677 = vmin.xlane.f32.xlu1 %v676_v58  ;;  %v651_v4 = vshll.u32 %v650_v6, 16 }
 0x5c1   :  { %v659_v34 = vpop.xlane.xlu0 %658  ;;  %v681_v42 = vshll.u32 %v680_v9, 16 }
 0x5c2   :  { %v734_v32 = vpop.xlane.xlu1 %733  ;;  %vm660_vm9 = vcmp.eq.f32.partialorder %v657_v49, %v659_v34  ;;  %v636_v49 = vshll.u32 %v635_v7, 16 }
 0x5c3   :  { %vm735_vm13 = vcmp.eq.f32.partialorder %v732_v27, %v734_v32  ;;  %v661_v29 = vsel %vm660_vm9, %v656_v12, inf  ;;  %v695_v27 = vcvt.f32.s32 %v689_v25  ;;  %v740_v58 = vcvt.f32.s32 %v734_v32 }
 0x5c4   :  { %v736_v57 = vsel %vm735_vm13, %v731_v43, inf  ;;  %662 = vmin.xlane.f32.xlu0 %v661_v29  ;;  %vm570_vm13 = vmor %vm386_vm8, %vm562_vm3  ;;  %vm2682_vm3 = vcmp.eq.s32.totalorder %v1836_v30, %v2038_v39 }
 0x5c5   :  { %737 = vmin.xlane.f32.xlu1 %v736_v57  ;;  %v2102_v50 = vpop.xlane.xlu0 %718  ;;  %v696_v55 = vshll.u32 %v695_v27, 16 }
 0x5c6   :  { %vm720_vm12 = vcmp.eq.f32.partialorder %v717_v8, %v2102_v50  ;;  %v711_v8 = vshll.u32 %v710_v26, 16 }
 0x5c7   :  { %v721_v5 = vsel %vm720_vm12, %v716_v45, inf  ;;  %vm568_vm12 = vmor %vm384_vm4, %vm560_vm14 }
 0x5c8   :  { %722 = vmin.xlane.f32.xlu0 %v721_v5  ;;  %vm567_vm4 = vmor %vm383_vm5, %vm559_vm15  ;;  %v725_v5 = vcvt.f32.s32 %v2102_v50 }
 0x5c9   :  { %vm572_vm14 = vmor %vm388_vm6, %vm564_vm0 }
 0x5ca   :  { %vm571_vm0 = vmor %vm387_vm7, %vm563_vm1 }
 0x645   :  { %v648_v22 = vpop.xlane.xlu1 %647 }
 0x646   :  { %v649_v53 = vcvt.f32.s32 %v648_v22 }
 0x648   :  { %v652_v60 = vadd.s32 %v651_v4, %v649_v53 }
 0x649   :  { %v633_v61 = vpop.xlane.xlu0 %632  ;;  %v708_v62 = vpop.xlane.xlu1 %707 }
 0x64a   :  { %v634_v41 = vcvt.f32.s32 %v633_v61  ;;  %v709_v59 = vcvt.f32.s32 %v708_v62  ;;  %vm744_vm11 = vcmp.eq.s32.totalorder %v1836_v30, %v652_v60 }
 0x64b   :  { %v2113_v35 = vsel %vm744_vm11, -3e+38, %v1990_v52  ;;  %vm2115_vm10 = vmor %vm568_vm12, %vm744_vm11  ;;  %v665_v52 = vcvt.f32.s32 %v659_v34  ;;  %vm2683_vm11 = vcmp.eq.s32.totalorder %v1836_v30, %v1918_v37 }
 0x64c   :  { %v637_v31 = vadd.s32 %v636_v49, %v634_v41  ;;  %v712_v28 = vadd.s32 %v711_v8, %v709_v59  ;;  %v770_v63 = vsel %vm222_vm2, %v2113_v35, -inf }
 0x64d   :  { %v693_v12 = vpop.xlane.xlu0 %692  ;;  %771 = vmax.xlane.f32.xlu1 %v770_v63  ;;  %v678_v43 = vpop.xlane.xlu1 %677 }
 0x64e   :  { %v694_v16 = vcvt.f32.s32 %v693_v12  ;;  %v679_v56 = vcvt.f32.s32 %v678_v43  ;;  %vm743_vm9 = vcmp.eq.s32.totalorder %v1836_v30, %v637_v31  ;;  %vm748_vm5 = vcmp.eq.s32.totalorder %v1836_v30, %v712_v28 }
 0x64f   :  { %v2136_v1 = vsel %vm743_vm9, -3e+38, %v2006_v0  ;;  %vm2138_vm15 = vmor %vm567_vm4, %vm743_vm9  ;;  %v2143_v32 = vsel %vm748_vm5, -3e+38, %v2012_v40  ;;  %v666_v0 = vshll.u32 %v665_v52, 16  ;;  %v741_v40 = vshll.u32 %v740_v58, 16 }
 0x650   :  { %v697_v3 = vadd.s32 %v696_v55, %v694_v16  ;;  %v682_v29 = vadd.s32 %v681_v42, %v679_v56  ;;  %v767_v2 = vsel %vm222_vm2, %v2136_v1, -inf  ;;  %v782_v57 = vsel %vm222_vm2, %v2143_v32, -inf  ;;  %vm2149_vm6 = vmor %vm572_vm14, %vm748_vm5 }
 0x651   :  { %768 = vmax.xlane.f32.xlu0 %v767_v2  ;;  %v663_v6 = vpop.xlane.xlu0 %662  ;;  %783 = vmax.xlane.f32.xlu1 %v782_v57  ;;  %vm569_vm4 = vmor %vm2683_vm11, %vm2682_vm3  ;;  %vm2684_vm14 = vcmp.eq.s32.totalorder %v1836_v30, %v2040_v54  ;;  %vm2685_vm9 = vcmp.eq.s32.totalorder %v1836_v30, %v1920_v38  ;;  %vm2690_vm3 = vcmp.eq.s32.totalorder %v1836_v30, %v2062_v48 }
 0x652   :  { %v738_v7 = vpop.xlane.xlu1 %737  ;;  %v664_v10 = vcvt.f32.s32 %v663_v6  ;;  %vm747_vm12 = vcmp.eq.s32.totalorder %v1836_v30, %v697_v3  ;;  %vm746_vm7 = vcmp.eq.s32.totalorder %v1836_v30, %v682_v29  ;;  %vm574_vm5 = vmor %vm2685_vm9, %vm2684_vm14  ;;  %vm2691_vm11 = vcmp.eq.s32.totalorder %v1836_v30, %v1942_v46 }
 0x653   :  { %v739_v22 = vcvt.f32.s32 %v738_v7  ;;  %v2169_v17 = vsel %vm747_vm12, -3e+38, %v2030_v33  ;;  %vm2171_vm1 = vmor %vm571_vm0, %vm747_vm12  ;;  %v2176_v4 = vsel %vm746_vm7, -3e+38, %v2036_v51  ;;  %v726_v51 = vshll.u32 %v725_v5, 16 }
 0x654   :  { %v667_v11 = vadd.s32 %v666_v0, %v664_v10  ;;  %v779_v21 = vsel %vm222_vm2, %v2169_v17, -inf  ;;  %v776_v53 = vsel %vm222_vm2, %v2176_v4, -inf  ;;  %vm2182_vm8 = vmor %vm570_vm13, %vm746_vm7 }
 0x655   :  { %v742_v26 = vadd.s32 %v741_v40, %v739_v22  ;;  %780 = vmax.xlane.f32.xlu0 %v779_v21  ;;  %v723_v33 = vpop.xlane.xlu0 %722  ;;  %777 = vmax.xlane.f32.xlu1 %v776_v53 }
 0x656   :  { %v724_v49 = vcvt.f32.s32 %v723_v33  ;;  %vm745_vm0 = vcmp.eq.s32.totalorder %v1836_v30, %v667_v11 }
 0x657   :  { %vm750_vm13 = vcmp.eq.s32.totalorder %v1836_v30, %v742_v26  ;;  %v2201_v39 = vsel %vm745_vm0, -3e+38, %v2054_v36  ;;  %vm2203_vm12 = vmor %vm569_vm4, %vm745_vm0 }
 0x658   :  { %v2208_v27 = vsel %vm750_vm13, -3e+38, %v2060_v47  ;;  %v727_v54 = vadd.s32 %v726_v51, %v724_v49  ;;  %v773_v38 = vsel %vm222_vm2, %v2201_v39, -inf  ;;  %vm2214_vm7 = vmor %vm574_vm5, %vm750_vm13 }
 0x659   :  { %v788_v9 = vsel %vm222_vm2, %v2208_v27, -inf  ;;  %774 = vmax.xlane.f32.xlu0 %v773_v38  ;;  %vm573_vm4 = vmor %vm2691_vm11, %vm2690_vm3 }
 0x65a   :  { %789 = vmax.xlane.f32.xlu1 %v788_v9  ;;  %vm749_vm14 = vcmp.eq.s32.totalorder %v1836_v30, %v727_v54 }
 0x65b   :  { %v2226_v36 = vsel %vm749_vm14, -3e+38, %v2074_v44  ;;  %vm2228_vm9 = vmor %vm573_vm4, %vm749_vm14 }
 0x65c   :  { %v785_v62 = vsel %vm222_vm2, %v2226_v36, -inf }
 0x65d   :  { %786 = vmax.xlane.f32.xlu0 %v785_v62 }
 0x6da   :  { %v772_v8 = vpop.xlane.xlu1 %771 }
 0x6db   :  { %vm792_vm5 = vcmp.eq.f32.partialorder %v2113_v35, %v772_v8 }
 0x6dc   :  { %v800_v48 = vsel %vm792_vm5, %v1836_v30, 64 }
 0x6dd   :  { %v822_v46 = vsel %vm222_vm2, %v800_v48, 2147483647 }
 0x6de   :  { %v769_v41 = vpop.xlane.xlu0 %768  ;;  %v784_v59 = vpop.xlane.xlu1 %783  ;;  %v824_v31 = vshra.s32 %v822_v46, 16  ;;  %v823_v48 = vand.u32 65535, %v822_v46 }
 0x6df   :  { %vm791_vm0 = vcmp.eq.f32.partialorder %v2136_v1, %v769_v41  ;;  %vm796_vm13 = vcmp.eq.f32.partialorder %v2143_v32, %v784_v59 }
 0x6e0   :  { %v799_v44 = vsel %vm791_vm0, %v1836_v30, 64  ;;  %v804_v28 = vsel %vm796_vm13, %v1836_v30, 64  ;;  %v826_v63 = vcvt.s32.f32 %v824_v31  ;;  %v825_v59 = vcvt.s32.f32 %v823_v48 }
 0x6e1   :  { %v807_v55 = vsel %vm222_vm2, %v799_v44, 2147483647  ;;  %v882_v42 = vsel %vm222_vm2, %v804_v28, 2147483647 }
 0x6e2   :  { %v781_v52 = vpop.xlane.xlu0 %780  ;;  %827 = vmin.xlane.f32.xlu1 %v826_v63  ;;  %v778_v58 = vpop.xlane.xlu1 %777  ;;  %v809_v12 = vshra.s32 %v807_v55, 16  ;;  %v884_v43 = vshra.s32 %v882_v42, 16  ;;  %v808_v31 = vand.u32 65535, %v807_v55  ;;  %v883_v44 = vand.u32 65535, %v882_v42 }
 0x6e3   :  { %vm795_vm3 = vcmp.eq.f32.partialorder %v2169_v17, %v781_v52  ;;  %vm794_vm11 = vcmp.eq.f32.partialorder %v2176_v4, %v778_v58 }
 0x6e4   :  { %v803_v16 = vsel %vm795_vm3, %v1836_v30, 64  ;;  %v802_v56 = vsel %vm794_vm11, %v1836_v30, 64  ;;  %v811_v3 = vcvt.s32.f32 %v809_v12  ;;  %v886_v29 = vcvt.s32.f32 %v884_v43 }
 0x6e5   :  { %v867_v2 = vsel %vm222_vm2, %v803_v16, 2147483647  ;;  %v852_v57 = vsel %vm222_vm2, %v802_v56, 2147483647  ;;  %v810_v12 = vcvt.s32.f32 %v808_v31  ;;  %v885_v43 = vcvt.s32.f32 %v883_v44 }
 0x6e6   :  { %812 = vmin.xlane.f32.xlu0 %v811_v3  ;;  %v775_v0 = vpop.xlane.xlu0 %774  ;;  %887 = vmin.xlane.f32.xlu1 %v886_v29  ;;  %v869_v5 = vshra.s32 %v867_v2, 16  ;;  %v854_v6 = vshra.s32 %v852_v57, 16  ;;  %v868_v16 = vand.u32 65535, %v867_v2  ;;  %v853_v56 = vand.u32 65535, %v852_v57 }
 0x6e7   :  { %v790_v40 = vpop.xlane.xlu1 %789  ;;  %vm793_vm4 = vcmp.eq.f32.partialorder %v2201_v39, %v775_v0 }
 0x6e8   :  { %vm798_vm14 = vcmp.eq.f32.partialorder %v2208_v27, %v790_v40  ;;  %v801_v7 = vsel %vm793_vm4, %v1836_v30, 64  ;;  %v871_v22 = vcvt.s32.f32 %v869_v5  ;;  %v856_v11 = vcvt.s32.f32 %v854_v6 }
 0x6e9   :  { %v806_v10 = vsel %vm798_vm14, %v1836_v30, 64  ;;  %v837_v26 = vsel %vm222_vm2, %v801_v7, 2147483647  ;;  %v870_v6 = vcvt.s32.f32 %v868_v16  ;;  %v855_v55 = vcvt.s32.f32 %v853_v56 }
 0x6ea   :  { %v912_v21 = vsel %vm222_vm2, %v806_v10, 2147483647  ;;  %872 = vmin.xlane.f32.xlu0 %v871_v22  ;;  %v787_v53 = vpop.xlane.xlu0 %786  ;;  %857 = vmin.xlane.f32.xlu1 %v856_v11  ;;  %v839_v33 = vshra.s32 %v837_v26, 16  ;;  %v838_v42 = vand.u32 65535, %v837_v26 }
 0x6eb   :  { %v914_v51 = vshra.s32 %v912_v21, 16  ;;  %vm797_vm5 = vcmp.eq.f32.partialorder %v2226_v36, %v787_v53 }
 0x6ec   :  { %v805_v49 = vsel %vm797_vm5, %v1836_v30, 64  ;;  %v841_v54 = vcvt.s32.f32 %v839_v33 }
 0x6ed   :  { %v916_v38 = vcvt.s32.f32 %v914_v51  ;;  %v897_v9 = vsel %vm222_vm2, %v805_v49, 2147483647 }
 0x6ee   :  { %842 = vmin.xlane.f32.xlu0 %v841_v54  ;;  %v899_v62 = vshra.s32 %v897_v9, 16  ;;  %v898_v53 = vand.u32 65535, %v897_v9 }
 0x6ef   :  { %917 = vmin.xlane.f32.xlu1 %v916_v38 }
 0x6f0   :  { %v901_v8 = vcvt.s32.f32 %v899_v62  ;;  %v900_v26 = vcvt.s32.f32 %v898_v53 }
 0x6f2   :  { %902 = vmin.xlane.f32.xlu0 %v901_v8 }
 0x76f   :  { %v828_v41 = vpop.xlane.xlu1 %827 }
 0x770   :  { %vm829_vm0 = vcmp.eq.f32.partialorder %v826_v63, %v828_v41  ;;  %v913_v63 = vand.u32 65535, %v912_v21 }
 0x771   :  { %v830_v28 = vsel %vm829_vm0, %v825_v59, inf }
 0x772   :  { %831 = vmin.xlane.f32.xlu1 %v830_v28 }
 0x773   :  { %v813_v52 = vpop.xlane.xlu0 %812  ;;  %v888_v58 = vpop.xlane.xlu1 %887 }
 0x774   :  { %vm814_vm13 = vcmp.eq.f32.partialorder %v811_v3, %v813_v52  ;;  %vm889_vm3 = vcmp.eq.f32.partialorder %v886_v29, %v888_v58  ;;  %v840_v3 = vcvt.s32.f32 %v838_v42  ;;  %v915_v29 = vcvt.s32.f32 %v913_v63 }
 0x775   :  { %v815_v0 = vsel %vm814_vm13, %v810_v12, inf  ;;  %v890_v40 = vsel %vm889_vm3, %v885_v43, inf  ;;  %v819_v21 = vcvt.f32.s32 %v813_v52  ;;  %v894_v59 = vcvt.f32.s32 %v888_v58 }
 0x776   :  { %816 = vmin.xlane.f32.xlu0 %v815_v0  ;;  %891 = vmin.xlane.f32.xlu1 %v890_v40 }
 0x777   :  { %v873_v46 = vpop.xlane.xlu0 %872  ;;  %v858_v5 = vpop.xlane.xlu1 %857  ;;  %v895_v43 = vshll.u32 %v894_v59, 16 }
 0x778   :  { %vm874_vm11 = vcmp.eq.f32.partialorder %v871_v22, %v873_v46  ;;  %vm859_vm4 = vcmp.eq.f32.partialorder %v856_v11, %v858_v5  ;;  %v834_v11 = vcvt.f32.s32 %v828_v41  ;;  %v864_v44 = vcvt.f32.s32 %v858_v5 }
 0x779   :  { %v875_v7 = vsel %vm874_vm11, %v870_v6, inf  ;;  %v860_v10 = vsel %vm859_vm4, %v855_v55, inf }
 0x77a   :  { %876 = vmin.xlane.f32.xlu0 %v875_v7  ;;  %861 = vmin.xlane.f32.xlu1 %v860_v10  ;;  %v835_v48 = vshll.u32 %v834_v11, 16 }
 0x77b   :  { %v843_v2 = vpop.xlane.xlu0 %842 }
 0x77c   :  { %v918_v57 = vpop.xlane.xlu1 %917  ;;  %vm844_vm14 = vcmp.eq.f32.partialorder %v841_v54, %v843_v2  ;;  %v820_v54 = vshll.u32 %v819_v21, 16  ;;  %v849_v5 = vcvt.f32.s32 %v843_v2 }
 0x77d   :  { %vm919_vm5 = vcmp.eq.f32.partialorder %v916_v38, %v918_v57  ;;  %v845_v33 = vsel %vm844_vm14, %v840_v3, inf  ;;  %v879_v38 = vcvt.f32.s32 %v873_v46  ;;  %v865_v46 = vshll.u32 %v864_v44, 16 }
 0x77e   :  { %v920_v51 = vsel %vm919_vm5, %v915_v29, inf  ;;  %846 = vmin.xlane.f32.xlu0 %v845_v33  ;;  %v924_v6 = vcvt.f32.s32 %v918_v57  ;;  %v850_v53 = vshll.u32 %v849_v5, 16 }
 0x77f   :  { %921 = vmin.xlane.f32.xlu1 %v920_v51  ;;  %v2258_v49 = vpop.xlane.xlu0 %902  ;;  %v880_v40 = vshll.u32 %v879_v38, 16 }
 0x780   :  { %vm904_vm0 = vcmp.eq.f32.partialorder %v901_v8, %v2258_v49  ;;  %v909_v33 = vcvt.f32.s32 %v2258_v49 }
 0x781   :  { %v905_v22 = vsel %vm904_vm0, %v900_v26, inf }
 0x782   :  { %906 = vmin.xlane.f32.xlu0 %v905_v22 }
 0x7ff   :  { %v832_v62 = vpop.xlane.xlu1 %831 }
 0x800   :  { %v833_v31 = vcvt.f32.s32 %v832_v62 }
 0x802   :  { %v836_v9 = vadd.s32 %v835_v48, %v833_v31  ;;  %v910_v31 = vshll.u32 %v909_v33, 16 }
 0x803   :  { %v817_v28 = vpop.xlane.xlu0 %816  ;;  %v892_v12 = vpop.xlane.xlu1 %891 }
 0x804   :  { %v818_v16 = vcvt.f32.s32 %v817_v28  ;;  %v893_v56 = vcvt.f32.s32 %v892_v12  ;;  %vm928_vm13 = vcmp.eq.s32.totalorder %v1836_v30, %v836_v9 }
 0x805   :  { %v2263_v8 = vsel %vm928_vm13, -3e+38, %v2113_v35  ;;  %vm2267_vm3 = vmor %vm2115_vm10, %vm928_vm13 }
 0x806   :  { %v821_v52 = vadd.s32 %v820_v54, %v818_v16  ;;  %v896_v58 = vadd.s32 %v895_v43, %v893_v56  ;;  %v954_v0 = vsel %vm222_vm2, %v2263_v8, -inf }
 0x807   :  { %v877_v55 = vpop.xlane.xlu0 %876  ;;  %955 = vmax.xlane.f32.xlu1 %v954_v0  ;;  %v862_v42 = vpop.xlane.xlu1 %861 }
 0x808   :  { %vm932_vm11 = vcmp.eq.s32.totalorder %v1836_v30, %v896_v58  ;;  %v878_v35 = vcvt.f32.s32 %v877_v55  ;;  %v863_v25 = vcvt.f32.s32 %v862_v42  ;;  %vm927_vm10 = vcmp.eq.s32.totalorder %v1836_v30, %v821_v52 }
 0x809   :  { %vm2277_vm4 = vmor %vm2149_vm6, %vm932_vm11  ;;  %v2282_v7 = vsel %vm927_vm10, -3e+38, %v2136_v1  ;;  %v2285_v10 = vsel %vm932_vm11, -3e+38, %v2143_v32  ;;  %v925_v1 = vshll.u32 %v924_v6, 16 }
 0x80a   :  { %v881_v2 = vadd.s32 %v880_v40, %v878_v35  ;;  %v866_v57 = vadd.s32 %v865_v46, %v863_v25  ;;  %v951_v3 = vsel %vm222_vm2, %v2282_v7, -inf  ;;  %vm2291_vm14 = vmor %vm2138_vm15, %vm927_vm10  ;;  %v966_v45 = vsel %vm222_vm2, %v2285_v10, -inf }
 0x80b   :  { %952 = vmax.xlane.f32.xlu0 %v951_v3  ;;  %v847_v32 = vpop.xlane.xlu0 %846  ;;  %967 = vmax.xlane.f32.xlu1 %v966_v45 }
 0x80c   :  { %v922_v51 = vpop.xlane.xlu1 %921  ;;  %vm931_vm6 = vcmp.eq.s32.totalorder %v1836_v30, %v881_v2  ;;  %vm930_vm5 = vcmp.eq.s32.totalorder %v1836_v30, %v866_v57  ;;  %v848_v34 = vcvt.f32.s32 %v847_v32 }
 0x80d   :  { %v923_v26 = vcvt.f32.s32 %v922_v51  ;;  %vm2302_vm15 = vmor %vm2171_vm1, %vm931_vm6  ;;  %v2307_v11 = vsel %vm931_vm6, -3e+38, %v2169_v17  ;;  %v2310_v49 = vsel %vm930_vm5, -3e+38, %v2176_v4 }
 0x80e   :  { %vm2314_vm0 = vmor %vm2182_vm8, %vm930_vm5  ;;  %v851_v62 = vadd.s32 %v850_v53, %v848_v34  ;;  %v963_v50 = vsel %vm222_vm2, %v2307_v11, -inf  ;;  %v960_v59 = vsel %vm222_vm2, %v2310_v49, -inf }
 0x80f   :  { %v926_v48 = vadd.s32 %v925_v1, %v923_v26  ;;  %964 = vmax.xlane.f32.xlu0 %v963_v50  ;;  %v907_v17 = vpop.xlane.xlu0 %906  ;;  %961 = vmax.xlane.f32.xlu1 %v960_v59 }
 0x810   :  { %vm929_vm1 = vcmp.eq.s32.totalorder %v1836_v30, %v851_v62  ;;  %v908_v4 = vcvt.f32.s32 %v907_v17 }
 0x811   :  { %vm934_vm13 = vcmp.eq.s32.totalorder %v1836_v30, %v926_v48  ;;  %vm2326_vm8 = vmor %vm2203_vm12, %vm929_vm1  ;;  %v2331_v9 = vsel %vm929_vm1, -3e+38, %v2201_v39 }
 0x812   :  { %v2334_v54 = vsel %vm934_vm13, -3e+38, %v2208_v27  ;;  %vm2338_vm11 = vmor %vm2214_vm7, %vm934_vm13  ;;  %v911_v44 = vadd.s32 %v910_v31, %v908_v4  ;;  %v957_v37 = vsel %vm222_vm2, %v2331_v9, -inf }
 0x813   :  { %v972_v28 = vsel %vm222_vm2, %v2334_v54, -inf  ;;  %958 = vmax.xlane.f32.xlu0 %v957_v37 }
 0x814   :  { %973 = vmax.xlane.f32.xlu1 %v972_v28  ;;  %vm933_vm12 = vcmp.eq.s32.totalorder %v1836_v30, %v911_v44 }
 0x815   :  { %vm2349_vm10 = vmor %vm2228_vm9, %vm933_vm12  ;;  %v2354_v27 = vsel %vm933_vm12, -3e+38, %v2226_v36 }
 0x816   :  { %v969_v61 = vsel %vm222_vm2, %v2354_v27, -inf }
 0x817   :  { %970 = vmax.xlane.f32.xlu0 %v969_v61 }
 0x894   :  { %v956_v12 = vpop.xlane.xlu1 %955 }
 0x895   :  { %vm976_vm7 = vcmp.eq.f32.partialorder %v2263_v8, %v956_v12 }
 0x896   :  { %v984_v43 = vsel %vm976_vm7, %v1836_v30, 64 }
 0x897   :  { %v1006_v16 = vsel %vm222_vm2, %v984_v43, 2147483647 }
 0x898   :  { %v1008_v56 = vshra.s32 %v1006_v16, 16  ;;  %v953_v47 = vpop.xlane.xlu0 %952  ;;  %v968_v52 = vpop.xlane.xlu1 %967  ;;  %v1007_v43 = vand.u32 65535, %v1006_v16 }
 0x899   :  { %vm975_vm9 = vcmp.eq.f32.partialorder %v2282_v7, %v953_v47  ;;  %vm980_vm6 = vcmp.eq.f32.partialorder %v2285_v10, %v968_v52 }
 0x89a   :  { %v983_v36 = vsel %vm975_vm9, %v1836_v30, 64  ;;  %v988_v58 = vsel %vm980_vm6, %v1836_v30, 64  ;;  %v1010_v0 = vcvt.s32.f32 %v1008_v56 }
 0x89b   :  { %v991_v40 = vsel %vm222_vm2, %v983_v36, 2147483647  ;;  %v1066_v46 = vsel %vm222_vm2, %v988_v58, 2147483647  ;;  %v1009_v36 = vcvt.s32.f32 %v1007_v43 }
 0x89c   :  { %v993_v5 = vshra.s32 %v991_v40, 16  ;;  %v1068_v6 = vshra.s32 %v1066_v46, 16  ;;  %v965_v55 = vpop.xlane.xlu0 %964  ;;  %1011 = vmin.xlane.f32.xlu1 %v1010_v0  ;;  %v962_v42 = vpop.xlane.xlu1 %961  ;;  %v992_v56 = vand.u32 65535, %v991_v40  ;;  %v1067_v47 = vand.u32 65535, %v1066_v46 }
 0x89d   :  { %vm979_vm5 = vcmp.eq.f32.partialorder %v2307_v11, %v965_v55  ;;  %vm978_vm1 = vcmp.eq.f32.partialorder %v2310_v49, %v962_v42 }
 0x89e   :  { %v987_v35 = vsel %vm979_vm5, %v1836_v30, 64  ;;  %v986_v25 = vsel %vm978_vm1, %v1836_v30, 64  ;;  %v995_v2 = vcvt.s32.f32 %v993_v5  ;;  %v1070_v57 = vcvt.s32.f32 %v1068_v6 }
 0x89f   :  { %v1051_v3 = vsel %vm222_vm2, %v987_v35, 2147483647  ;;  %v1036_v45 = vsel %vm222_vm2, %v986_v25, 2147483647  ;;  %v994_v35 = vcvt.s32.f32 %v992_v56  ;;  %v1069_v25 = vcvt.s32.f32 %v1067_v47 }
 0x8a0   :  { %v1053_v53 = vshra.s32 %v1051_v3, 16  ;;  %v1038_v1 = vshra.s32 %v1036_v45, 16  ;;  %996 = vmin.xlane.f32.xlu0 %v995_v2  ;;  %v959_v33 = vpop.xlane.xlu0 %958  ;;  %1071 = vmin.xlane.f32.xlu1 %v1070_v57  ;;  %v1052_v5 = vand.u32 65535, %v1051_v3  ;;  %v1037_v6 = vand.u32 65535, %v1036_v45 }
 0x8a1   :  { %v974_v32 = vpop.xlane.xlu1 %973  ;;  %vm977_vm13 = vcmp.eq.f32.partialorder %v2331_v9, %v959_v33 }
 0x8a2   :  { %vm982_vm12 = vcmp.eq.f32.partialorder %v2334_v54, %v974_v32  ;;  %v985_v51 = vsel %vm977_vm13, %v1836_v30, 64  ;;  %v1055_v26 = vcvt.s32.f32 %v1053_v53  ;;  %v1040_v62 = vcvt.s32.f32 %v1038_v1 }
 0x8a3   :  { %v990_v34 = vsel %vm982_vm12, %v1836_v30, 64  ;;  %v1021_v48 = vsel %vm222_vm2, %v985_v51, 2147483647  ;;  %v1054_v32 = vcvt.s32.f32 %v1052_v5 }
 0x8a4   :  { %v1096_v50 = vsel %vm222_vm2, %v990_v34, 2147483647  ;;  %v1023_v59 = vshra.s32 %v1021_v48, 16  ;;  %1056 = vmin.xlane.f32.xlu0 %v1055_v26  ;;  %v971_v31 = vpop.xlane.xlu0 %970  ;;  %1041 = vmin.xlane.f32.xlu1 %v1040_v62  ;;  %v1022_v16 = vand.u32 65535, %v1021_v48 }
 0x8a5   :  { %v1098_v17 = vshra.s32 %v1096_v50, 16  ;;  %vm981_vm7 = vcmp.eq.f32.partialorder %v2354_v27, %v971_v31  ;;  %v1097_v40 = vand.u32 65535, %v1096_v50 }
 0x8a6   :  { %v989_v4 = vsel %vm981_vm7, %v1836_v30, 64  ;;  %v1025_v44 = vcvt.s32.f32 %v1023_v59 }
 0x8a7   :  { %v1100_v37 = vcvt.s32.f32 %v1098_v17  ;;  %v1081_v28 = vsel %vm222_vm2, %v989_v4, 2147483647  ;;  %v1099_v59 = vcvt.s32.f32 %v1097_v40 }
 0x8a8   :  { %v1083_v61 = vshra.s32 %v1081_v28, 16  ;;  %1026 = vmin.xlane.f32.xlu0 %v1025_v44  ;;  %v1082_v51 = vand.u32 65535, %v1081_v28 }
 0x8a9   :  { %1101 = vmin.xlane.f32.xlu1 %v1100_v37 }
 0x8aa   :  { %v1085_v12 = vcvt.s32.f32 %v1083_v61  ;;  %v1084_v31 = vcvt.s32.f32 %v1082_v51 }
 0x8ac   :  { %1086 = vmin.xlane.f32.xlu0 %v1085_v12 }
 0x929   :  { %v1012_v52 = vpop.xlane.xlu1 %1011 }
 0x92a   :  { %vm1013_vm9 = vcmp.eq.f32.partialorder %v1010_v0, %v1012_v52  ;;  %v1039_v0 = vcvt.s32.f32 %v1037_v6 }
 0x92b   :  { %v1014_v58 = vsel %vm1013_vm9, %v1009_v36, inf }
 0x92c   :  { %1015 = vmin.xlane.f32.xlu1 %v1014_v58 }
 0x92d   :  { %v997_v55 = vpop.xlane.xlu0 %996  ;;  %v1072_v42 = vpop.xlane.xlu1 %1071 }
 0x92e   :  { %vm998_vm6 = vcmp.eq.f32.partialorder %v995_v2, %v997_v55  ;;  %vm1073_vm5 = vcmp.eq.f32.partialorder %v1070_v57, %v1072_v42  ;;  %v1024_v57 = vcvt.s32.f32 %v1022_v16  ;;  %v1003_v4 = vcvt.f32.s32 %v997_v55 }
 0x92f   :  { %v999_v53 = vsel %vm998_vm6, %v994_v35, inf  ;;  %v1074_v1 = vsel %vm1073_vm5, %v1069_v25, inf  ;;  %v1078_v43 = vcvt.f32.s32 %v1072_v42 }
 0x930   :  { %1000 = vmin.xlane.f32.xlu0 %v999_v53  ;;  %1075 = vmin.xlane.f32.xlu1 %v1074_v1 }
 0x931   :  { %v1057_v46 = vpop.xlane.xlu0 %1056  ;;  %v1042_v33 = vpop.xlane.xlu1 %1041  ;;  %v1079_v6 = vshll.u32 %v1078_v43, 16 }
 0x932   :  { %vm1058_vm1 = vcmp.eq.f32.partialorder %v1055_v26, %v1057_v46  ;;  %vm1043_vm13 = vcmp.eq.f32.partialorder %v1040_v62, %v1042_v33  ;;  %v1018_v62 = vcvt.f32.s32 %v1012_v52  ;;  %v1048_v36 = vcvt.f32.s32 %v1042_v33 }
 0x933   :  { %v1059_v3 = vsel %vm1058_vm1, %v1054_v32, inf  ;;  %v1044_v45 = vsel %vm1043_vm13, %v1039_v0, inf }
 0x934   :  { %1060 = vmin.xlane.f32.xlu0 %v1059_v3  ;;  %1045 = vmin.xlane.f32.xlu1 %v1044_v45  ;;  %v1019_v61 = vshll.u32 %v1018_v62, 16  ;;  %v1049_v16 = vshll.u32 %v1048_v36, 16 }
 0x935   :  { %v1027_v34 = vpop.xlane.xlu0 %1026 }
 0x936   :  { %v1102_v2 = vpop.xlane.xlu1 %1101  ;;  %vm1028_vm12 = vcmp.eq.f32.partialorder %v1025_v44, %v1027_v34  ;;  %v1004_v44 = vshll.u32 %v1003_v4, 16  ;;  %v1033_v40 = vcvt.f32.s32 %v1027_v34 }
 0x937   :  { %vm1103_vm7 = vcmp.eq.f32.partialorder %v1100_v37, %v1102_v2  ;;  %v1029_v17 = vsel %vm1028_vm12, %v1024_v57, inf  ;;  %v1063_v37 = vcvt.f32.s32 %v1057_v46  ;;  %v1108_v46 = vcvt.f32.s32 %v1102_v2 }
 0x938   :  { %v1104_v48 = vsel %vm1103_vm7, %v1099_v59, inf  ;;  %1030 = vmin.xlane.f32.xlu0 %v1029_v17 }
 0x939   :  { %1105 = vmin.xlane.f32.xlu1 %v1104_v48  ;;  %v2382_v50 = vpop.xlane.xlu0 %1086  ;;  %v1064_v1 = vshll.u32 %v1063_v37, 16  ;;  %v1109_v29 = vshll.u32 %v1108_v46, 16 }
 0x93a   :  { %vm1088_vm9 = vcmp.eq.f32.partialorder %v1085_v12, %v2382_v50  ;;  %v1093_v17 = vcvt.f32.s32 %v2382_v50 }
 0x93b   :  { %v1089_v26 = vsel %vm1088_vm9, %v1084_v31, inf }
 0x93c   :  { %1090 = vmin.xlane.f32.xlu0 %v1089_v26 }
 0x9b9   :  { %v1016_v28 = vpop.xlane.xlu1 %1015 }
 0x9ba   :  { %v1017_v56 = vcvt.f32.s32 %v1016_v28 }
 0x9bc   :  { %v1020_v47 = vadd.s32 %v1019_v61, %v1017_v56 }
 0x9bd   :  { %v1001_v58 = vpop.xlane.xlu0 %1000  ;;  %v1076_v5 = vpop.xlane.xlu1 %1075 }
 0x9be   :  { %v1002_v35 = vcvt.f32.s32 %v1001_v58  ;;  %v1077_v25 = vcvt.f32.s32 %v1076_v5  ;;  %vm1112_vm6 = vcmp.eq.s32.totalorder %v1836_v30, %v1020_v47 }
 0x9bf   :  { %v2387_v12 = vsel %vm1112_vm6, -3e+38, %v2263_v8  ;;  %vm2391_vm5 = vmor %vm2267_vm3, %vm1112_vm6 }
 0x9c0   :  { %v1005_v55 = vadd.s32 %v1004_v44, %v1002_v35  ;;  %v1080_v42 = vadd.s32 %v1079_v6, %v1077_v25  ;;  %v1138_v53 = vsel %vm222_vm2, %v2387_v12, -inf }
 0x9c1   :  { %v1061_v33 = vpop.xlane.xlu0 %1060  ;;  %1139 = vmax.xlane.f32.xlu1 %v1138_v53  ;;  %v1046_v32 = vpop.xlane.xlu1 %1045 }
 0x9c2   :  { %v1062_v8 = vcvt.f32.s32 %v1061_v33  ;;  %v1047_v0 = vcvt.f32.s32 %v1046_v32  ;;  %vm1111_vm1 = vcmp.eq.s32.totalorder %v1836_v30, %v1005_v55  ;;  %vm1116_vm3 = vcmp.eq.s32.totalorder %v1836_v30, %v1080_v42 }
 0x9c3   :  { %v1127_v41 = vsel %vm1111_vm1, -3e+38, %v2282_v7  ;;  %vm2402_vm13 = vmor %vm2291_vm14, %vm1111_vm1  ;;  %v1132_v45 = vsel %vm1116_vm3, -3e+38, %v2285_v10  ;;  %v1034_v7 = vshll.u32 %v1033_v40, 16 }
 0x9c4   :  { %v1065_v51 = vadd.s32 %v1064_v1, %v1062_v8  ;;  %v1050_v34 = vadd.s32 %v1049_v16, %v1047_v0  ;;  %v1135_v2 = vsel %vm222_vm2, %v1127_v41, -inf  ;;  %v1150_v57 = vsel %vm222_vm2, %v1132_v45, -inf  ;;  %vm2411_vm12 = vmor %vm2277_vm4, %vm1116_vm3 }
 0x9c5   :  { %1136 = vmax.xlane.f32.xlu0 %v1135_v2  ;;  %v1031_v48 = vpop.xlane.xlu0 %1030  ;;  %1151 = vmax.xlane.f32.xlu1 %v1150_v57 }
 0x9c6   :  { %v1106_v10 = vpop.xlane.xlu1 %1105  ;;  %v1032_v31 = vcvt.f32.s32 %v1031_v48  ;;  %vm1115_vm14 = vcmp.eq.s32.totalorder %v1836_v30, %v1065_v51  ;;  %vm1114_vm7 = vcmp.eq.s32.totalorder %v1836_v30, %v1050_v34 }
 0x9c7   :  { %v1107_v26 = vcvt.f32.s32 %v1106_v10  ;;  %v1131_v63 = vsel %vm1115_vm14, -3e+38, %v2307_v11  ;;  %vm2421_vm4 = vmor %vm2302_vm15, %vm1115_vm14  ;;  %v1130_v50 = vsel %vm1114_vm7, -3e+38, %v2310_v49  ;;  %v1094_v11 = vshll.u32 %v1093_v17, 16 }
 0x9c8   :  { %v1035_v4 = vadd.s32 %v1034_v7, %v1032_v31  ;;  %v1147_v61 = vsel %vm222_vm2, %v1131_v63, -inf  ;;  %v1144_v43 = vsel %vm222_vm2, %v1130_v50, -inf  ;;  %vm2430_vm9 = vmor %vm2314_vm0, %vm1114_vm7 }
 0x9c9   :  { %v1110_v28 = vadd.s32 %v1109_v29, %v1107_v26  ;;  %1148 = vmax.xlane.f32.xlu0 %v1147_v61  ;;  %v1091_v22 = vpop.xlane.xlu0 %1090  ;;  %1145 = vmax.xlane.f32.xlu1 %v1144_v43 }
 0x9ca   :  { %v1092_v47 = vcvt.f32.s32 %v1091_v22  ;;  %vm1113_vm15 = vcmp.eq.s32.totalorder %v1836_v30, %v1035_v4 }
 0x9cb   :  { %vm1118_vm6 = vcmp.eq.s32.totalorder %v1836_v30, %v1110_v28  ;;  %v1129_v49 = vsel %vm1113_vm15, -3e+38, %v2331_v9  ;;  %vm2439_vm1 = vmor %vm2326_vm8, %vm1113_vm15 }
 0x9cc   :  { %v1134_v21 = vsel %vm1118_vm6, -3e+38, %v2334_v54  ;;  %v1095_v37 = vadd.s32 %v1094_v11, %v1092_v47  ;;  %v1141_v36 = vsel %vm222_vm2, %v1129_v49, -inf  ;;  %vm2448_vm0 = vmor %vm2338_vm11, %vm1118_vm6 }
 0x9cd   :  { %v1156_v58 = vsel %vm222_vm2, %v1134_v21, -inf  ;;  %1142 = vmax.xlane.f32.xlu0 %v1141_v36 }
 0x9ce   :  { %1157 = vmax.xlane.f32.xlu1 %v1156_v58  ;;  %vm1117_vm8 = vcmp.eq.s32.totalorder %v1836_v30, %v1095_v37 }
 0x9cf   :  { %v1133_v60 = vsel %vm1117_vm8, -3e+38, %v2354_v27  ;;  %vm2456_vm3 = vmor %vm2349_vm10, %vm1117_vm8 }
 0x9d0   :  { %v1153_v54 = vsel %vm222_vm2, %v1133_v60, -inf }
 0x9d1   :  { %1154 = vmax.xlane.f32.xlu0 %v1153_v54 }
 0xa4e   :  { %v1140_v38 = vpop.xlane.xlu1 %1139 }
 0xa4f   :  { %vm1160_vm11 = vcmp.eq.f32.partialorder %v2387_v12, %v1140_v38 }
 0xa50   :  { %v1168_v6 = vsel %vm1160_vm11, %v1836_v30, 64 }
 0xa51   :  { %v1190_v35 = vsel %vm222_vm2, %v1168_v6, 2147483647 }
 0xa52   :  { %v1192_v25 = vshra.s32 %v1190_v35, 16  ;;  %v1137_v55 = vpop.xlane.xlu0 %1136  ;;  %v1152_v42 = vpop.xlane.xlu1 %1151 }
 0xa53   :  { %vm1159_vm14 = vcmp.eq.f32.partialorder %v1127_v41, %v1137_v55  ;;  %vm1164_vm7 = vcmp.eq.f32.partialorder %v1132_v45, %v1152_v42 }
 0xa54   :  { %v1167_v39 = vsel %vm1159_vm14, %v1836_v30, 64  ;;  %v1172_v27 = vsel %vm1164_vm7, %v1836_v30, 64  ;;  %v1194_v53 = vcvt.s32.f32 %v1192_v25 }
 0xa55   :  { %v1175_v1 = vsel %vm222_vm2, %v1167_v39, 2147483647  ;;  %v1250_v16 = vsel %vm222_vm2, %v1172_v27, 2147483647 }
 0xa56   :  { %v1177_v40 = vshra.s32 %v1175_v1, 16  ;;  %v1252_v12 = vshra.s32 %v1250_v16, 16  ;;  %v1149_v46 = vpop.xlane.xlu0 %1148  ;;  %1195 = vmin.xlane.f32.xlu1 %v1194_v53  ;;  %v1146_v33 = vpop.xlane.xlu1 %1145  ;;  %v1251_v37 = vand.u32 65535, %v1250_v16 }
 0xa57   :  { %vm1163_vm10 = vcmp.eq.f32.partialorder %v1131_v63, %v1149_v46  ;;  %vm1162_vm15 = vcmp.eq.f32.partialorder %v1130_v50, %v1146_v33 }
 0xa58   :  { %v1171_v32 = vsel %vm1163_vm10, %v1836_v30, 64  ;;  %v1170_v8 = vsel %vm1162_vm15, %v1836_v30, 64  ;;  %v1179_v0 = vcvt.s32.f32 %v1177_v40  ;;  %v1254_v41 = vcvt.s32.f32 %v1252_v12 }
 0xa59   :  { %v1235_v45 = vsel %vm222_vm2, %v1171_v32, 2147483647  ;;  %v1220_v51 = vsel %vm222_vm2, %v1170_v8, 2147483647  ;;  %v1253_v42 = vcvt.s32.f32 %v1251_v37 }
 0xa5a   :  { %v1237_v34 = vshra.s32 %v1235_v45, 16  ;;  %v1222_v2 = vshra.s32 %v1220_v51, 16  ;;  %1180 = vmin.xlane.f32.xlu0 %v1179_v0  ;;  %v1143_v57 = vpop.xlane.xlu0 %1142  ;;  %1255 = vmin.xlane.f32.xlu1 %v1254_v41  ;;  %v1221_v38 = vand.u32 65535, %v1220_v51 }
 0xa5b   :  { %v1158_v7 = vpop.xlane.xlu1 %1157  ;;  %vm1161_vm6 = vcmp.eq.f32.partialorder %v1129_v49, %v1143_v57  ;;  %v1191_v49 = vand.u32 65535, %v1190_v35 }
 0xa5c   :  { %vm1166_vm8 = vcmp.eq.f32.partialorder %v1134_v21, %v1158_v7  ;;  %v1169_v29 = vsel %vm1161_vm6, %v1836_v30, 64  ;;  %v1239_v48 = vcvt.s32.f32 %v1237_v34  ;;  %v1224_v10 = vcvt.s32.f32 %v1222_v2 }
 0xa5d   :  { %v1174_v17 = vsel %vm1166_vm8, %v1836_v30, 64  ;;  %v1205_v31 = vsel %vm222_vm2, %v1169_v29, 2147483647  ;;  %v1176_v21 = vand.u32 65535, %v1175_v1  ;;  %v1193_v58 = vcvt.s32.f32 %v1191_v49 }
 0xa5e   :  { %v1280_v26 = vsel %vm222_vm2, %v1174_v17, 2147483647  ;;  %v1207_v63 = vshra.s32 %v1205_v31, 16  ;;  %1240 = vmin.xlane.f32.xlu0 %v1239_v48  ;;  %v1155_v4 = vpop.xlane.xlu0 %1154  ;;  %1225 = vmin.xlane.f32.xlu1 %v1224_v10  ;;  %v1206_v35 = vand.u32 65535, %v1205_v31  ;;  %v2726_v29 = vlaneseq }
 0xa5f   :  { %v1282_v50 = vshra.s32 %v1280_v26, 16  ;;  %vm1165_vm11 = vcmp.eq.f32.partialorder %v1133_v60, %v1155_v4  ;;  %v1236_v60 = vand.u32 65535, %v1235_v45  ;;  %v1178_v55 = vcvt.s32.f32 %v1176_v21 }
 0xa60   :  { %v1173_v28 = vsel %vm1165_vm11, %v1836_v30, 64  ;;  %v1209_v61 = vcvt.s32.f32 %v1207_v63  ;;  %v1281_v1 = vand.u32 65535, %v1280_v26  ;;  %v2482_v17 = vshrl.u32 %v2726_v29, 7 }
 0xa61   :  { %v1284_v43 = vcvt.s32.f32 %v1282_v50  ;;  %v1265_v22 = vsel %vm222_vm2, %v1173_v28, 2147483647  ;;  %v1238_v12 = vcvt.s32.f32 %v1236_v60 }
 0xa62   :  { %v1267_v11 = vshra.s32 %v1265_v22, 16  ;;  %1210 = vmin.xlane.f32.xlu0 %v1209_v61  ;;  %v1266_v32 = vand.u32 65535, %v1265_v22  ;;  %v1283_v45 = vcvt.s32.f32 %v1281_v1  ;;  %v1313_v26 = vadd.s32 8, %v2482_v17 }
 0xa63   :  { %1285 = vmin.xlane.f32.xlu1 %v1284_v43  ;;  %v1319_v59 = vadd.s32 56, %v2482_v17  ;;  %v1318_v62 = vadd.s32 48, %v2482_v17 }
 0xa64   :  { %v1269_v47 = vcvt.s32.f32 %v1267_v11  ;;  %v1268_v57 = vcvt.s32.f32 %v1266_v32 }
 0xa66   :  { %1270 = vmin.xlane.f32.xlu0 %v1269_v47 }
 0xae3   :  { %v1196_v36 = vpop.xlane.xlu1 %1195 }
 0xae4   :  { %vm1197_vm14 = vcmp.eq.f32.partialorder %v1194_v53, %v1196_v36  ;;  %v1223_v53 = vcvt.s32.f32 %v1221_v38 }
 0xae5   :  { %v1198_v54 = vsel %vm1197_vm14, %v1193_v58, inf  ;;  %v1317_v58 = vadd.s32 40, %v2482_v17 }
 0xae6   :  { %1199 = vmin.xlane.f32.xlu1 %v1198_v54 }
 0xae7   :  { %v1181_v6 = vpop.xlane.xlu0 %1180  ;;  %v1256_v25 = vpop.xlane.xlu1 %1255 }
 0xae8   :  { %vm1182_vm7 = vcmp.eq.f32.partialorder %v1179_v0, %v1181_v6  ;;  %vm1257_vm10 = vcmp.eq.f32.partialorder %v1254_v41, %v1256_v25  ;;  %v1208_v41 = vcvt.s32.f32 %v1206_v35  ;;  %v1262_v50 = vcvt.f32.s32 %v1256_v25 }
 0xae9   :  { %v1183_v39 = vsel %vm1182_vm7, %v1178_v55, inf  ;;  %v1258_v27 = vsel %vm1257_vm10, %v1253_v42, inf  ;;  %vm1330_vm7 = vcmp.ne.s32.totalorder %v1836_v30, %v1313_v26 }
 0xaea   :  { %1184 = vmin.xlane.f32.xlu0 %v1183_v39  ;;  %1259 = vmin.xlane.f32.xlu1 %v1258_v27  ;;  %v1316_v27 = vadd.s32 32, %v2482_v17 }
 0xaeb   :  { %v1241_v16 = vpop.xlane.xlu0 %1240  ;;  %v1226_v40 = vpop.xlane.xlu1 %1225 }
 0xaec   :  { %vm1242_vm15 = vcmp.eq.f32.partialorder %v1239_v48, %v1241_v16  ;;  %vm1227_vm6 = vcmp.eq.f32.partialorder %v1224_v10, %v1226_v40  ;;  %v1202_v48 = vcvt.f32.s32 %v1196_v36  ;;  %v1187_v10 = vcvt.f32.s32 %v1181_v6 }
 0xaed   :  { %v1243_v46 = vsel %vm1242_vm15, %v1238_v12, inf  ;;  %v1228_v33 = vsel %vm1227_vm6, %v1223_v53, inf  ;;  %v1247_v28 = vcvt.f32.s32 %v1241_v16  ;;  %v1232_v22 = vcvt.f32.s32 %v1226_v40 }
 0xaee   :  { %1244 = vmin.xlane.f32.xlu0 %v1243_v46  ;;  %1229 = vmin.xlane.f32.xlu1 %v1228_v33  ;;  %v1203_v63 = vshll.u32 %v1202_v48, 16 }
 0xaef   :  { %v1211_v8 = vpop.xlane.xlu0 %1210  ;;  %v1248_v36 = vshll.u32 %v1247_v28, 16  ;;  %v1233_v25 = vshll.u32 %v1232_v22, 16  ;;  %v2584_v22 = vstv %s2658_s0  ;;  %s1700_s0 = smov [#allocation9]  }
 0xaf0   :  { %v1286_v0 = vpop.xlane.xlu1 %1285  ;;  %vm1212_vm8 = vcmp.eq.f32.partialorder %v1209_v61, %v1211_v8  ;;  %v1217_v54 = vcvt.f32.s32 %v1211_v8  ;;  %v1314_v8 = vadd.s32 16, %v2482_v17  ;;  %s1469_s18 = sshll.u32 %s1700_s0, 4  ;;  %s1470_s18 = int_to_ptr.vmem [resolvable:$true] %s1469_s18 }
 0xaf1   :  { %vm1287_vm11 = vcmp.eq.f32.partialorder %v1284_v43, %v1286_v0  ;;  %v1213_v51 = vsel %vm1212_vm8, %v1208_v41, inf  ;;  %v1188_v43 = vshll.u32 %v1187_v10, 16  ;;  %v1292_v60 = vcvt.f32.s32 %v1286_v0  ;;  %s1644_s21 = scalar_lea.vmem %s1470_s18, 1024  ;;  %p1649_p3 = scmp.lt.s32.totalorder %s1470_s18, %s1470_s18 }
 0xaf2   :  { %v1288_v34 = vsel %vm1287_vm11, %v1283_v45, inf  ;;  %1214 = vmin.xlane.f32.xlu0 %v1213_v51  ;;  %vm1329_vm8 = vcmp.ne.s32.totalorder %v1836_v30, %v2482_v17  ;;  %v1218_v16 = vshll.u32 %v1217_v54, 16  ;;  %p1645_p2 = scmp.ne.s32.totalorder %s1470_s18, %s1644_s21  ;;  %p1650_p4 = scmp.lt.s32.totalorder %s1644_s21, %s1644_s21 }
 0xaf3   :  { %1289 = vmin.xlane.f32.xlu1 %v1288_v34  ;;  %v2478_v2 = vpop.xlane.xlu0 %1270  ;;  %v1293_v40 = vshll.u32 %v1292_v60, 16  ;;  %v1401_v60 = vld [vmem:[#allocation6] sm:$0xff] }
 0xaf4   :  { %vm1272_vm14 = vcmp.eq.f32.partialorder %v1269_v47, %v2478_v2  ;;  %v1263_v47 = vshll.u32 %v1262_v50, 16  ;;  %v1277_v46 = vcvt.f32.s32 %v2478_v2  ;;  %p1651_p5 = por %p1650_p4, %p1649_p3 }
 0xaf5   :  { %v1273_v7 = vsel %vm1272_vm14, %v1268_v57, inf }
 0xaf6   :  { %1274 = vmin.xlane.f32.xlu0 %v1273_v7  ;;  %v1278_v57 = vshll.u32 %v1277_v46, 16  ;;  %p1652_p6 = pnand %p1651_p5, %p1645_p2 }
 0xb73   :  { %v1200_v31 = vpop.xlane.xlu1 %1199 }
 0xb74   :  { %v1201_v4 = vcvt.f32.s32 %v1200_v31 }
 0xb76   :  { %v1204_v61 = vadd.s32 %v1203_v63, %v1201_v4 }
 0xb77   :  { %v1185_v11 = vpop.xlane.xlu0 %1184  ;;  %v1260_v49 = vpop.xlane.xlu1 %1259 }
 0xb78   :  { %vm1296_vm10 = vcmp.eq.s32.totalorder %v1836_v30, %v1204_v61  ;;  %v1186_v21 = vcvt.f32.s32 %v1185_v11  ;;  %v1261_v37 = vcvt.f32.s32 %v1260_v49 }
 0xb79   :  { %vm1304_vm15 = vmor %vm2391_vm5, %vm1296_vm10 }
 0xb7a   :  { %v1189_v38 = vadd.s32 %v1188_v43, %v1186_v21  ;;  %v1264_v6 = vadd.s32 %v1263_v47, %v1261_v37  ;;  %vm1338_vm6 = vmand %vm1304_vm15, %vm1330_vm7  ;;  %vm1334_vm7 = vcmp.ne.s32.totalorder %v1836_v30, %v1317_v58  ;;  %vm1333_vm15 = vcmp.ne.s32.totalorder %v1836_v30, %v1316_v27  ;;  %v1402_v43 = vld [vmem:[#allocation6 + $0x8] sm:$0xff] }
 0xb7b   :  { %v1245_v55 = vpop.xlane.xlu0 %1244  ;;  %v1230_v42 = vpop.xlane.xlu1 %1229  ;;  %v2491_v39 = vsel %vm1338_vm6, %v1803_v13, 0.0  ;;  %v1315_v13 = vadd.s32 24, %v2482_v17  ;;  %v2586_v47 = vstv %s1418_s15 }
 0xb7c   :  { %vm1295_vm5 = vcmp.eq.s32.totalorder %v1836_v30, %v1189_v38  ;;  %vm1300_vm11 = vcmp.eq.s32.totalorder %v1836_v30, %v1264_v6  ;;  %v1246_v52 = vcvt.f32.s32 %v1245_v55  ;;  %v1231_v35 = vcvt.f32.s32 %v1230_v42  ;;  %v1406_v6 = vld [vmem:[#allocation6 + $0x28] sm:$0xff] }
 0xb7d   :  { %v1356_v1 = vsel %vm222_vm2, %v2491_v39, 0.0  ;;  %vm1303_vm14 = vmor %vm2402_vm13, %vm1295_vm5 }
 0xb7e   :  { %v1249_v12 = vadd.s32 %v1248_v36, %v1246_v52  ;;  %v1234_v53 = vadd.s32 %v1233_v25, %v1231_v35  ;;  %1357 = vadd.xlane.f32.xlu1 %v1356_v1  ;;  %vm1337_vm10 = vmand %vm1303_vm14, %vm1329_vm8  ;;  %v1411_v36 = vmul.f32 %v2584_v22, %v1402_v43  ;;  %v1410_v35 = vmul.f32 %v2584_v22, %v1401_v60 }
 0xb7f   :  { %v1215_v33 = vpop.xlane.xlu0 %1214  ;;  %v2509_v3 = vsel %vm1337_vm10, %v1807_v15, 0.0  ;;  %vm1308_vm13 = vmor %vm2411_vm12, %vm1300_vm11  ;;  %vm1332_vm11 = vcmp.ne.s32.totalorder %v1836_v30, %v1315_v13 }
 0xb80   :  { %v1290_v32 = vpop.xlane.xlu1 %1289  ;;  %vm1299_vm6 = vcmp.eq.s32.totalorder %v1836_v30, %v1249_v12  ;;  %vm1298_vm8 = vcmp.eq.s32.totalorder %v1836_v30, %v1234_v53  ;;  %v1216_v0 = vcvt.f32.s32 %v1215_v33  ;;  %vm1342_vm5 = vmand %vm1308_vm13, %vm1334_vm7  ;;  %v1353_v15 = vsel %vm222_vm2, %v2509_v3, 0.0  ;;  %v1404_v12 = vld [vmem:[#allocation6 + $0x18] sm:$0xff] }
 0xb81   :  { %v1291_v41 = vcvt.f32.s32 %v1290_v32  ;;  %v2524_v45 = vsel %vm1342_vm5, %v1805_v14, 0.0  ;;  %vm1307_vm12 = vmor %vm2421_vm4, %vm1299_vm6  ;;  %1354 = vadd.xlane.f32.xlu0 %v1353_v15  ;;  %vm1331_vm7 = vcmp.ne.s32.totalorder %v1836_v30, %v1314_v8  ;;  %vm1336_vm6 = vcmp.ne.s32.totalorder %v1836_v30, %v1319_v59 }
 0xb82   :  { %v1219_v51 = vadd.s32 %v1218_v16, %v1216_v0  ;;  %v1368_v2 = vsel %vm222_vm2, %v2524_v45, 0.0  ;;  %vm1341_vm14 = vmand %vm1307_vm12, %vm1333_vm15  ;;  %vm1335_vm12 = vcmp.ne.s32.totalorder %v1836_v30, %v1318_v62  ;;  %v1405_v16 = vld [vmem:[#allocation6 + $0x20] sm:$0xff] }
 0xb83   :  { %v1294_v34 = vadd.s32 %v1293_v40, %v1291_v41  ;;  %1369 = vadd.xlane.f32.xlu1 %v1368_v2  ;;  %v1275_v14 = vpop.xlane.xlu0 %1274  ;;  %v2535_v7 = vsel %vm1341_vm14, %v1813_v18, 0.0  ;;  %vm1306_vm4 = vmor %vm2430_vm9, %vm1298_vm8  ;;  %v1413_v41 = vmul.f32 %v2584_v22, %v1404_v12 }
 0xb84   :  { %vm1297_vm10 = vcmp.eq.s32.totalorder %v1836_v30, %v1219_v51  ;;  %v1276_v29 = vcvt.f32.s32 %v1275_v14  ;;  %v1365_v48 = vsel %vm222_vm2, %v2535_v7, 0.0  ;;  %vm1340_vm15 = vmand %vm1306_vm4, %vm1332_vm11  ;;  %v1408_v51 = vld [vmem:[#allocation6 + $0x38] sm:$0xff] }
 0xb85   :  { %vm1302_vm13 = vcmp.eq.s32.totalorder %v1836_v30, %v1294_v34  ;;  %v2550_v18 = vsel %vm1340_vm15, %v1815_v19, 0.0  ;;  %vm1305_vm9 = vmor %vm2439_vm1, %vm1297_vm10  ;;  %1366 = vadd.xlane.f32.xlu0 %v1365_v48  ;;  %v1417_v48 = vmul.f32 %v2584_v22, %v1408_v51 }
 0xb86   :  { %v1279_v56 = vadd.s32 %v1278_v57, %v1276_v29  ;;  %v1362_v17 = vsel %vm222_vm2, %v2550_v18, 0.0  ;;  %vm1339_vm8 = vmand %vm1305_vm9, %vm1331_vm7 }
 0xb87   :  { %1363 = vadd.xlane.f32.xlu1 %v1362_v17  ;;  %v2558_v10 = vsel %vm1339_vm8, %v1823_v23, 0.0  ;;  %vm1310_vm5 = vmor %vm2448_vm0, %vm1302_vm13 }
 0xb88   :  { %vm1301_vm11 = vcmp.eq.s32.totalorder %v1836_v30, %v1279_v56  ;;  %v1359_v19 = vsel %vm222_vm2, %v2558_v10, 0.0  ;;  %vm1344_vm1 = vmand %vm1310_vm5, %vm1336_vm6  ;;  %v1407_v56 = vld [vmem:[#allocation6 + $0x30] sm:$0xff] }
 0xb89   :  { %v2567_v44 = vsel %vm1344_vm1, %v1817_v20, 0.0  ;;  %vm1309_vm14 = vmor %vm2456_vm3, %vm1301_vm11  ;;  %1360 = vadd.xlane.f32.xlu0 %v1359_v19 }
 0xb8a   :  { %v1374_v23 = vsel %vm222_vm2, %v2567_v44, 0.0  ;;  %vm1343_vm4 = vmand %vm1309_vm14, %vm1335_vm12 }
 0xb8b   :  { %1375 = vadd.xlane.f32.xlu1 %v1374_v23  ;;  %v2574_v5 = vsel %vm1343_vm4, %v1825_v24, 0.0 }
 0xb8c   :  { %v1371_v30 = vsel %vm222_vm2, %v2574_v5, 0.0 }
 0xb8d   :  { %1372 = vadd.xlane.f32.xlu0 %v1371_v30  ;;  %v1416_v30 = vmul.f32 %v2584_v22, %v1407_v56 }
 0xc0b   :  { %v1358_v31 = vpop.xlane.xlu1 %1357 }
 0xc0c   :  { %v1378_v26 = vadd.f32 1e-06, %v1358_v31 }
 0xc0e   :  { %1584 = vrcp.f32 %v1378_v26  ;;  %v1355_v20 = vpop.xlane.xlu0 %1354 }
 0xc0f   :  { %v1377_v63 = vadd.f32 1e-06, %v1355_v20 }
 0xc10   :  { %v1370_v9 = vpop.xlane.xlu1 %1369 }
 0xc11   :  { %v1382_v50 = vadd.f32 1e-06, %v1370_v9  ;;  %1586 = vrcp.f32 %v1377_v63 }
 0xc12   :  { %v1367_v4 = vpop.xlane.xlu0 %1366 }
 0xc13   :  { %1588 = vrcp.f32 %v1382_v50  ;;  %v1381_v24 = vadd.f32 1e-06, %v1367_v4 }
 0xc14   :  { %v1364_v28 = vpop.xlane.xlu1 %1363 }
 0xc15   :  { %v1380_v61 = vadd.f32 1e-06, %v1364_v28  ;;  %1590 = vrcp.f32 %v1381_v24 }
 0xc16   :  { %v1361_v11 = vpop.xlane.xlu0 %1360 }
 0xc17   :  { %1592 = vrcp.f32 %v1380_v61  ;;  %v1379_v21 = vadd.f32 1e-06, %v1361_v11 }
 0xc18   :  { %v1585_v49 = vpop.eup %1584  ;;  %v1376_v37 = vpop.xlane.xlu1 %1375 }
 0xc19   :  { %v1388_v58 = vmul.f32 %v1585_v49, %v2491_v39  ;;  %v1384_v54 = vadd.f32 1e-06, %v1376_v37  ;;  %1594 = vrcp.f32 %v1379_v21  ;;  %v1415_v39 = vmul.f32 %v2584_v22, %v1406_v6 }
 0xc1a   :  { %v1373_v25 = vpop.xlane.xlu0 %1372 }
 0xc1b   :  { %v1421_v38 = vmul.f32 %v2586_v47, %v1388_v58  ;;  %1437 = vst.msk [vmem:[#allocation9 + $0x8] sm:$0xff] %vm222_vm2, %v1388_v58  ;;  %1596 = vrcp.f32 %v1384_v54  ;;  %v1587_v55 = vpop.eup %1586  ;;  %v1383_v42 = vadd.f32 1e-06, %v1373_v25 }
 0xc1c   :  { %v1386_v1 = vmul.f32 %v1587_v55, %v2509_v3  ;;  %v1414_v3 = vmul.f32 %v2584_v22, %v1405_v16 }
 0xc1d   :  { %v1589_v27 = vpop.eup %1588  ;;  %v1429_v52 = vadd.f32 %v1421_v38, %v1411_v36  ;;  %1598 = vrcp.f32 %v1383_v42 }
 0xc1e   :  { %v1396_v13 = vmul.f32 %v1589_v27, %v2524_v45  ;;  %v1420_v40 = vmul.f32 %v2586_v47, %v1386_v1  ;;  %1436 = vst.msk [vmem:[#allocation9] sm:$0xff] %vm222_vm2, %v1386_v1  ;;  %v1403_v45 = vld [vmem:[#allocation6 + $0x10] sm:$0xff] }
 0xc1f   :  { %1445 = vst.msk [vmem:[#allocation8 + $0x8] sm:$0xff] %vm222_vm2, %v1429_v52  ;;  %v1591_v53 = vpop.eup %1590 }
 0xc20   :  { %v1425_v46 = vmul.f32 %v2586_v47, %v1396_v13  ;;  %1441 = vst.msk [vmem:[#allocation9 + $0x28] sm:$0xff] %vm222_vm2, %v1396_v13  ;;  %v1428_v32 = vadd.f32 %v1420_v40, %v1410_v35  ;;  %v1394_v8 = vmul.f32 %v1591_v53, %v2535_v7  ;;  %v1412_v7 = vmul.f32 %v2584_v22, %v1403_v45 }
 0xc21   :  { %v1593_v33 = vpop.eup %1592 }
 0xc22   :  { %v1433_v0 = vadd.f32 %v1425_v46, %v1415_v39  ;;  %v1392_v15 = vmul.f32 %v1593_v33, %v2550_v18  ;;  %1444 = vst.msk [vmem:[#allocation8] sm:$0xff] %vm222_vm2, %v1428_v32  ;;  %v1424_v59 = vmul.f32 %v2586_v47, %v1394_v8  ;;  %1440 = vst.msk [vmem:[#allocation9 + $0x20] sm:$0xff] %vm222_vm2, %v1394_v8 }
 0xc23   :  { %v1595_v34 = vpop.eup %1594 }
 0xc24   :  { %1449 = vst.msk [vmem:[#allocation8 + $0x28] sm:$0xff] %vm222_vm2, %v1433_v0  ;;  %v1423_v2 = vmul.f32 %v2586_v47, %v1392_v15  ;;  %1439 = vst.msk [vmem:[#allocation9 + $0x18] sm:$0xff] %vm222_vm2, %v1392_v15  ;;  %v1432_v14 = vadd.f32 %v1424_v59, %v1414_v3  ;;  %v1390_v62 = vmul.f32 %v1595_v34, %v2558_v10 }
 0xc25   :  { %v1597_v57 = vpop.eup %1596 }
 0xc26   :  { %v1431_v29 = vadd.f32 %v1423_v2, %v1413_v41  ;;  %v1400_v18 = vmul.f32 %v1597_v57, %v2567_v44  ;;  %1448 = vst.msk [vmem:[#allocation8 + $0x20] sm:$0xff] %vm222_vm2, %v1432_v14  ;;  %v1422_v17 = vmul.f32 %v2586_v47, %v1390_v62  ;;  %1438 = vst.msk [vmem:[#allocation9 + $0x10] sm:$0xff] %vm222_vm2, %v1390_v62 }
 0xc27   :  { %v1599_v19 = vpop.eup %1598 }
 0xc28   :  { %1447 = vst.msk [vmem:[#allocation8 + $0x18] sm:$0xff] %vm222_vm2, %v1431_v29  ;;  %v1427_v23 = vmul.f32 %v2586_v47, %v1400_v18  ;;  %1443 = vst.msk [vmem:[#allocation9 + $0x38] sm:$0xff] %vm222_vm2, %v1400_v18  ;;  %v1430_v10 = vadd.f32 %v1422_v17, %v1412_v7  ;;  %v1398_v44 = vmul.f32 %v1599_v19, %v2574_v5 }
 0xc2a   :  { %v1435_v31 = vadd.f32 %v1427_v23, %v1417_v48  ;;  %1446 = vst.msk [vmem:[#allocation8 + $0x10] sm:$0xff] %vm222_vm2, %v1430_v10  ;;  %v1426_v26 = vmul.f32 %v2586_v47, %v1398_v44  ;;  %1442 = vst.msk [vmem:[#allocation9 + $0x30] sm:$0xff] %vm222_vm2, %v1398_v44 }
 0xc2c   :  { %1451 = vst.msk [vmem:[#allocation8 + $0x38] sm:$0xff] %vm222_vm2, %v1435_v31 }
 0xc2d   :  { %1655 = shalt.err (!%p1652_p6)
}
 0xc2e   :  { %s1656_s24 = scalar_lea.hbm %s2662_s4, 1024 }
 0xc2f   :  { %p1657_p7 = scmp.ne.s32.totalorder %s2662_s4, %s1656_s24  ;;  %p1660_p8 = scmp.lt.u32.totalorder %s1656_s24, %s2662_s4 }
 0xc31   :  { %p1662_p9 = pnand %p1660_p8, %p1657_p7 }
 0xc33   :  { %1665 = shalt.err (!%p1662_p9)
}
 0xc34   :  { %1475 = dma.vmem_to_hbm [thread:$0]  %s1470_s18, 1024, %s2662_s4, [#allocation10], %s1697_s25, %s1697_s25, %s1698_s26   ;;  %v1434_v5 = vadd.f32 %v1426_v26, %v1416_v30 }
 0xc35   :  { %s1666_s7 = scalar_lea.vmem %s1458_s20, 1024  ;;  %p1671_p11 = scmp.lt.s32.totalorder %s1458_s20, %s1458_s20 }
 0xc36   :  { %1450 = vst.msk [vmem:[#allocation8 + $0x30] sm:$0xff] %vm222_vm2, %v1434_v5  ;;  %p1667_p10 = scmp.ne.s32.totalorder %s1458_s20, %s1666_s7  ;;  %p1672_p12 = scmp.lt.s32.totalorder %s1666_s7, %s1666_s7 }
 0xc38   :  { %p1673_p13 = por %p1672_p12, %p1671_p11 }
 0xc3a   :  { %p1674_p0 = pnand %p1673_p13, %p1667_p10 }
 0xc3c   :  { %1677 = shalt.err (!%p1674_p0)
}
 0xc3d   :  { %s1678_s10 = scalar_lea.hbm %s2661_s3, 1024 }
 0xc3e   :  { %p1679_p1 = scmp.ne.s32.totalorder %s2661_s3, %s1678_s10  ;;  %p1682_p2 = scmp.lt.u32.totalorder %s1678_s10, %s2661_s3 }
 0xc40   :  { %p1684_p3 = pnand %p1682_p2, %p1679_p1 }
 0xc42   :  { %1687 = shalt.err (!%p1684_p3)
}
 0xc43   :  { %1463 = dma.vmem_to_hbm [thread:$0]  %s1458_s20, 1024, %s2661_s3, [#allocation5], %s1697_s25, %s1697_s25, %s1698_s26  }
 0xc44   :  { %1692 = dma.done.wait [#allocation5], 1024  }
 0xc45   :  { %1693 = vsyncadd [#allocation5], 4294966272 }
 0xc46   :  { %1694 = dma.done.wait [#allocation10], 1024  }
 0xc47   :  { %1695 = vsyncadd [#allocation10], 4294966272 }
 0xc48   :  { %1482 = vsyncpa [#allocation4], 1 }
 0xc49   :  { %1483 = vsyncpa [#allocation7], 1 }
 0xc4a   :  { %1484 = vsyncpa [#allocation5], 1 }
 0xc4b   :  { %1485 = vsyncpa [#allocation10], 1 }

</bundles_post_ra>
